<compile_context>
chip_gen: v6e
topology: v6e:2x2x1
jax: 0.10.0
libtpu: 0.0.40
codegen_flags: <defaults>
</compile_context>

<pallas_src>
import jax
import jax.numpy as jnp
import numpy as np
from jax.experimental import pallas as pl
from jax.experimental.pallas import tpu as pltpu


# ---------------------------------------------------------------------------
# Pallas kernel: fused conv-as-one-matmul + mask + max-pool + bias + ReLU + fc
# ---------------------------------------------------------------------------
def textcnn_kernel(x_ref, wp_ref, bp_ref, mask_ref, wfc_ref, bfc_ref, out_ref):
    tb, lout_pad, k_pack = x_ref.shape       # (TB, Lout_pad, 128)  bf16 im2col slab
    nf_pad = wp_ref.shape[1]                 # 128 (3F=48 real filter columns)

    # All conv branches & taps in ONE MXU matmul (bf16 operands, f32 accumulation).
    x = x_ref[...].reshape(tb * lout_pad, k_pack)            # layout-trivial merge
    z = jnp.dot(x, wp_ref[...], preferred_element_type=jnp.float32)
    z = z.reshape(tb, lout_pad, nf_pad) + mask_ref[...].astype(jnp.float32)[None]

    # max over time, then bias (commutes with max), then ReLU (monotone)
    pooled = jnp.maximum(jnp.max(z, axis=1) + bp_ref[...], 0.0)      # (TB, 128) f32

    # fused final Linear on the bf16 MXU path, lane-dense padded (TB, 128) output
    out_ref[...] = (jnp.dot(pooled.astype(wfc_ref.dtype), wfc_ref[...],
                            preferred_element_type=jnp.float32)
                    + bfc_ref[...])


# ---------------------------------------------------------------------------
# Parameter packing (done once, outside the kernel)
# ---------------------------------------------------------------------------
def pack_params(conv_ws, conv_bs, wfc, bfc, filter_sizes, seq_len, pad_idx,
                compute_dtype=jnp.bfloat16):
    E = conv_ws[0].shape[1]
    F = conv_ws[0].shape[2]
    O = wfc.shape[1]
    fs_max = max(filter_sizes)
    assert seq_len >= fs_max, "every conv branch needs >= 1 valid time position"

    k_raw = fs_max * E                                     # im2col contraction depth
    k_pack = ((max(k_raw, 128) + 127) // 128) * 128        # lane-aligned (32*4 -> 128)
    nf = len(filter_sizes) * F
    nf_pad = ((max(nf, 128) + 127) // 128) * 128           # 3F=48 -> 128
    o_pad = ((max(O, 128) + 127) // 128) * 128             # O=4   -> 128
    lout_max = seq_len - min(filter_sizes) + 1
    lout_pad = ((lout_max + 7) // 8) * 8                   # sublane-aligned

    wp = np.zeros((k_pack, nf_pad), np.float32)
    bp = np.zeros((1, nf_pad), np.float32)
    mask = np.zeros((lout_pad, nf_pad), np.float32)
    for i, fs in enumerate(filter_sizes):
        w = np.asarray(conv_ws[i])                         # (fs, E, F)
        b = np.asarray(conv_bs[i])                         # (1, F)
        c0 = i * F
        for k in range(fs):
            wp[k * E:(k + 1) * E, c0:c0 + F] = w[k]
        bp[0, c0:c0 + F] = b[0]
        lout = seq_len - fs + 1
        mask[lout:, c0:c0 + F] = -1e30                     # invalid time positions

    wfc_p = np.zeros((nf_pad, o_pad), np.float32)
    wfc_p[:nf, :O] = np.asarray(wfc)
    bfc_p = np.zeros((1, o_pad), np.float32)
    bfc_p[0, :O] = np.asarray(bfc)[0]

    packed = dict(
        wp=jnp.asarray(wp).astype(compute_dtype),          # bf16 MXU operand
        bp=jnp.asarray(bp),                                # f32 (added to f32 acc)
        mask=jnp.asarray(mask).astype(compute_dtype),      # bf16 time mask
        wfc=jnp.asarray(wfc_p).astype(compute_dtype),      # bf16 MXU operand
        bfc=jnp.asarray(bfc_p),                            # f32
    )
    dims = dict(E=E, O=O, fs_max=fs_max, k_raw=k_raw, k_pack=k_pack,
                nf_pad=nf_pad, o_pad=o_pad, lout_pad=lout_pad,
                L=seq_len, pad_idx=pad_idx)
    return packed, dims


# ---------------------------------------------------------------------------
# Wrapper: fused gather+im2col slab, batch-tile heuristic, gridded pallas_call
# ---------------------------------------------------------------------------
def textcnn_forward(text, embed_table, packed, dims, *, tb=None):
    B, L = text.shape
    assert L == dims["L"]
    E, fs_max = dims["E"], dims["fs_max"]
    lout_pad, k_pack, k_raw = dims["lout_pad"], dims["k_pack"], dims["k_raw"]
    nf_pad, o_pad = dims["nf_pad"], dims["o_pad"]

    # --- gather + im2col fused in the wrapper: lane-dense (B, Lout_pad, 128) bf16
    # slab built straight from the embedding table (no (B, L, E) intermediate).
    # Tokens past L use pad ids; they only ever meet zeroed weight rows / masked
    # time positions, so their values never reach the output.
    l_need = lout_pad + fs_max - 1
    ids = jnp.full((B, l_need), dims["pad_idx"], jnp.int32).at[:, :L].set(text)
    win = jnp.stack([ids[:, k:k + lout_pad] for k in range(fs_max)], axis=-1)
    table = embed_table.astype(jnp.bfloat16)
    x = jnp.take(table, win.reshape(-1), axis=0).reshape(B, lout_pad, k_raw)
    if k_pack != k_raw:
        x = jnp.pad(x, ((0, 0), (0, 0), (0, k_pack - k_raw)))

    # --- batch tile: target ~512-1024 matmul rows per step; keep >= 2 grid steps
    # so the ("parallel",) batch axis actually shards over v7x's two TensorCores.
    if tb is None:
        target = max(8, 1024 // lout_pad)
        tb = min(B, target)
        while B % tb:
            tb -= 1
        if B // tb < 2 and B > 1:
            half = max(1, tb // 2)
            while B % half:
                half -= 1
            tb = half
    assert B % tb == 0
    grid = (B // tb,)

    # --- explicit VMEM budget (v5e scoped default is 16 MiB); cap at v7x's 64 MiB
    x_bytes = tb * lout_pad * k_pack * 2
    z_bytes = tb * lout_pad * nf_pad * 4
    const_bytes = (k_pack * nf_pad * 2 + nf_pad * 4 + lout_pad * nf_pad * 2
                   + nf_pad * o_pad * 2 + o_pad * 4)
    out_bytes = tb * o_pad * 4
    vmem_need = 2 * x_bytes + z_bytes + const_bytes + 2 * out_bytes
    vmem_limit = int(min(max(2 * vmem_need + (8 << 20), 32 << 20), 64 << 20))

    flops = 2 * B * lout_pad * k_pack * nf_pad + 2 * B * nf_pad * o_pad
    bytes_accessed = (x.size * 2 + k_pack * nf_pad * 2 + nf_pad * 4
                      + lout_pad * nf_pad * 2 + nf_pad * o_pad * 2 + o_pad * 4
                      + B * o_pad * 4)

    def launch(single_buffer_consts):
        # Grid-constant operands are fetched once; single-buffer them to reclaim
        # VMEM for the batch tile (matters most on v7x's 64 MiB VMEM).
        const_kw = ({"pipeline_mode": pl.Buffered(1)}
                    if single_buffer_consts else {})
        return pl.pallas_call(
            textcnn_kernel,
            out_shape=jax.ShapeDtypeStruct((B, o_pad), jnp.float32),
            grid_spec=pltpu.PrefetchScalarGridSpec(
                num_scalar_prefetch=0,
                grid=grid,
                in_specs=[
                    pl.BlockSpec((tb, lout_pad, k_pack), lambda b: (b, 0, 0)),
                    pl.BlockSpec((k_pack, nf_pad), lambda b: (0, 0), **const_kw),
                    pl.BlockSpec((1, nf_pad), lambda b: (0, 0), **const_kw),
                    pl.BlockSpec((lout_pad, nf_pad), lambda b: (0, 0), **const_kw),
                    pl.BlockSpec((nf_pad, o_pad), lambda b: (0, 0), **const_kw),
                    pl.BlockSpec((1, o_pad), lambda b: (0, 0), **const_kw),
                ],
                out_specs=pl.BlockSpec((tb, o_pad), lambda b: (b, 0)),
            ),
            compiler_params=pltpu.CompilerParams(
                dimension_semantics=("parallel",),
                vmem_limit_bytes=vmem_limit),
            cost_estimate=pl.CostEstimate(flops=flops, transcendentals=0,
                                          bytes_accessed=bytes_accessed),
        )(x, packed["wp"], packed["bp"], packed["mask"],
          packed["wfc"], packed["bfc"])

    try:
        out = launch(True)
    except Exception:
        # pipeline_mode=pl.Buffered(1) unsupported on this jax build -> fall back
        # to default double buffering (constants are < 100 KiB here anyway).
        out = launch(False)

    return out[:, :dims["O"]]          # lane-dense padded output sliced to (B, O)


# ---------------------------------------------------------------------------
# Pure-JAX reference (mirrors the PyTorch forward; bf16 operands, f32 accum)
# ---------------------------------------------------------------------------
def textcnn_ref(text, embed_table, conv_ws, conv_bs, wfc, bfc):
    emb = jnp.take(embed_table, text, axis=0).astype(jnp.bfloat16)
    L = emb.shape[1]
    pooled = []
    for w, b in zip(conv_ws, conv_bs):
        w = w.astype(jnp.bfloat16)
        fs = w.shape[0]
        lout = L - fs + 1
        conv = sum(jnp.einsum('ble,ef->blf', emb[:, k:k + lout, :], w[k],
                              preferred_element_type=jnp.float32)
                   for k in range(fs)) + b[None]
        conv = jnp.maximum(conv, 0.0)
        pooled.append(jnp.max(conv, axis=1))
    cat = jnp.concatenate(pooled, axis=1)
    return (jnp.dot(cat.astype(jnp.bfloat16), wfc.astype(jnp.bfloat16),
                    preferred_element_type=jnp.float32) + bfc)


# ---------------------------------------------------------------------------
# Parameter setup + run
# ---------------------------------------------------------------------------
if __name__ == "__main__":
    vocab_size = 50
    output_dim = 4
    pad_idx = 0
    embedding_dim = 32          # E  (fs_max*E = 128 -> full MXU contraction depth)
    n_filters = 16              # F  (3F = 48 real filters, padded to 128 lanes)
    filter_sizes = [2, 3, 4]
    B, L = 64, 16               # small demo batch/seq; tb heuristic still yields
                                # >=2 grid steps and ~512-row matmuls per step

    key = jax.random.PRNGKey(0)
    keys = jax.random.split(key, 8)

    # nn.Embedding(vocab, E, padding_idx=pad_idx): N(0,1), pad row zeroed
    embed_table = jax.random.normal(keys[0], (vocab_size, embedding_dim), jnp.float32)
    embed_table = embed_table.at[pad_idx].set(0.0)

    # Conv1d weights stored as (fs, E, F); biases (1, F)
    def conv_params(k, fs):
        scale = 1.0 / np.sqrt(embedding_dim * fs)
        w = jax.random.uniform(k, (fs, embedding_dim, n_filters),
                               jnp.float32, -scale, scale)
        b = jax.random.uniform(jax.random.fold_in(k, 1), (1, n_filters),
                               jnp.float32, -scale, scale)
        return w, b

    conv_ws, conv_bs = [], []
    for i, fs in enumerate(filter_sizes):
        w, b = conv_params(keys[1 + i], fs)
        conv_ws.append(w)
        conv_bs.append(b)

    # Linear(3F, O): weight stored as (3F, O), bias (1, O)
    fc_in = len(filter_sizes) * n_filters
    fc_scale = 1.0 / np.sqrt(fc_in)
    wfc = jax.random.uniform(keys[4], (fc_in, output_dim), jnp.float32,
                             -fc_scale, fc_scale)
    bfc = jax.random.uniform(keys[5], (1, output_dim), jnp.float32,
                             -fc_scale, fc_scale)

    # input tokens (B, L) with some pad tokens
    text = jax.random.randint(keys[6], (B, L), 0, vocab_size, jnp.int32)
    text = text.at[0, -3:].set(pad_idx)

    packed, dims = pack_params(conv_ws, conv_bs, wfc, bfc, filter_sizes, L, pad_idx)
    out = textcnn_forward(text, embed_table, packed, dims)
    out = jax.block_until_ready(out)

    ref = textcnn_ref(text, embed_table, conv_ws, conv_bs, wfc, bfc)
    if not np.allclose(np.asarray(out), np.asarray(ref), atol=3e-2, rtol=3e-2):
        raise AssertionError("Pallas TEXTCNN output mismatch vs JAX reference")

    print("KERNEL_OK")
</pallas_src>

<mosaic_0001>
module attributes {stable_mosaic.version = 11 : i64} {
  func.func @textcnn_kernel(%arg0: i32, %arg1: memref<32x16x128xbf16, #tpu.memory_space<vmem>>, %arg2: memref<128x128xbf16, #tpu.memory_space<vmem>>, %arg3: memref<1x128xf32, #tpu.memory_space<vmem>>, %arg4: memref<16x128xbf16, #tpu.memory_space<vmem>>, %arg5: memref<128x128xbf16, #tpu.memory_space<vmem>>, %arg6: memref<1x128xf32, #tpu.memory_space<vmem>>, %arg7: memref<32x128xf32, #tpu.memory_space<vmem>>) attributes {dimension_semantics = [#tpu.dimension_semantics<parallel>], iteration_bounds = array<i64: 2>, scalar_prefetch = 0 : i64, scratch_operands = 0 : i64, tpu.core_type = #tpu.core_type<tc>, window_params = [{transform_indices = @transform_0, window_bounds = array<i64: 32, 16, 128>}, {pipeline_mode = #tpu.pipeline_mode<synchronous>, transform_indices = @transform_1, window_bounds = array<i64: 128, 128>}, {pipeline_mode = #tpu.pipeline_mode<synchronous>, transform_indices = @transform_2, window_bounds = array<i64: 1, 128>}, {pipeline_mode = #tpu.pipeline_mode<synchronous>, transform_indices = @transform_3, window_bounds = array<i64: 16, 128>}, {pipeline_mode = #tpu.pipeline_mode<synchronous>, transform_indices = @transform_4, window_bounds = array<i64: 128, 128>}, {pipeline_mode = #tpu.pipeline_mode<synchronous>, transform_indices = @transform_5, window_bounds = array<i64: 1, 128>}, {transform_indices = @transform_6, window_bounds = array<i64: 32, 128>}]} {
    %c0 = arith.constant 0 : index
    %c0_0 = arith.constant 0 : index
    %c0_1 = arith.constant 0 : index
    %0 = vector.load %arg1[%c0, %c0_0, %c0_1] : memref<32x16x128xbf16, #tpu.memory_space<vmem>>, vector<32x16x128xbf16>
    %1 = vector.shape_cast %0 : vector<32x16x128xbf16> to vector<512x128xbf16>
    %c0_2 = arith.constant 0 : index
    %c0_3 = arith.constant 0 : index
    %2 = vector.load %arg2[%c0_2, %c0_3] : memref<128x128xbf16, #tpu.memory_space<vmem>>, vector<128x128xbf16>
    %cst = arith.constant dense<0.000000e+00> : vector<512x128xf32>
    %3 = tpu.matmul %1, %2, %cst {dimension_numbers = #tpu.dot_dimension_numbers<[1], [0], [0], [1], [0, 0, 1, 1], [], []>} : vector<512x128xbf16>, vector<128x128xbf16>, vector<512x128xf32> -> vector<512x128xf32>
    %4 = vector.shape_cast %3 : vector<512x128xf32> to vector<32x16x128xf32>
    %c0_4 = arith.constant 0 : index
    %c0_5 = arith.constant 0 : index
    %5 = vector.load %arg4[%c0_4, %c0_5] : memref<16x128xbf16, #tpu.memory_space<vmem>>, vector<16x128xbf16>
    %6 = arith.extf %5 : vector<16x128xbf16> to vector<16x128xf32>
    %7 = vector.shape_cast %6 : vector<16x128xf32> to vector<1x16x128xf32>
    %8 = vector.broadcast %7 : vector<1x16x128xf32> to vector<32x16x128xf32>
    %9 = arith.addf %4, %8 : vector<32x16x128xf32>
    %cst_6 = arith.constant dense<0xFF800000> : vector<32x128xf32>
    %10 = vector.multi_reduction <maximumf>, %9, %cst_6 [1] : vector<32x16x128xf32> to vector<32x128xf32>
    %c0_7 = arith.constant 0 : index
    %c0_8 = arith.constant 0 : index
    %11 = vector.load %arg3[%c0_7, %c0_8] : memref<1x128xf32, #tpu.memory_space<vmem>>, vector<1x128xf32>
    %12 = vector.broadcast %11 : vector<1x128xf32> to vector<32x128xf32>
    %13 = arith.addf %10, %12 : vector<32x128xf32>
    %cst_9 = arith.constant 0.000000e+00 : f32
    %14 = vector.broadcast %cst_9 : f32 to vector<32x128xf32>
    %15 = arith.maximumf %13, %14 : vector<32x128xf32>
    %16 = arith.truncf %15 : vector<32x128xf32> to vector<32x128xbf16>
    %c0_10 = arith.constant 0 : index
    %c0_11 = arith.constant 0 : index
    %17 = vector.load %arg5[%c0_10, %c0_11] : memref<128x128xbf16, #tpu.memory_space<vmem>>, vector<128x128xbf16>
    %cst_12 = arith.constant dense<0.000000e+00> : vector<32x128xf32>
    %18 = tpu.matmul %16, %17, %cst_12 {dimension_numbers = #tpu.dot_dimension_numbers<[1], [0], [0], [1], [0, 0, 1, 1], [], []>} : vector<32x128xbf16>, vector<128x128xbf16>, vector<32x128xf32> -> vector<32x128xf32>
    %c0_13 = arith.constant 0 : index
    %c0_14 = arith.constant 0 : index
    %19 = vector.load %arg6[%c0_13, %c0_14] : memref<1x128xf32, #tpu.memory_space<vmem>>, vector<1x128xf32>
    %20 = vector.broadcast %19 : vector<1x128xf32> to vector<32x128xf32>
    %21 = arith.addf %18, %20 : vector<32x128xf32>
    %c0_15 = arith.constant 0 : index
    %c0_16 = arith.constant 0 : index
    %22 = vector.load %arg7[%c0_15, %c0_16] : memref<32x128xf32, #tpu.memory_space<vmem>>, vector<32x128xf32>
    tpu.vector_store %arg7[%c0_15, %c0_16], %21 {strides = array<i32>} : memref<32x128xf32, #tpu.memory_space<vmem>>, vector<32x128xf32>,
    return
  }
  func.func @transform_0(%arg0: i32) -> (i32, i32, i32) {
    %c0_i32 = arith.constant 0 : i32
    %c0_i32_0 = arith.constant 0 : i32
    %c0_i32_1 = arith.constant 0 : i32
    return %arg0, %c0_i32, %c0_i32_0 : i32, i32, i32
  }
  func.func @transform_1(%arg0: i32) -> (i32, i32) {
    %c0_i32 = arith.constant 0 : i32
    %c0_i32_0 = arith.constant 0 : i32
    %c0_i32_1 = arith.constant 0 : i32
    return %c0_i32, %c0_i32_0 : i32, i32
  }
  func.func @transform_2(%arg0: i32) -> (i32, i32) {
    %c0_i32 = arith.constant 0 : i32
    %c0_i32_0 = arith.constant 0 : i32
    %c0_i32_1 = arith.constant 0 : i32
    return %c0_i32, %c0_i32_0 : i32, i32
  }
  func.func @transform_3(%arg0: i32) -> (i32, i32) {
    %c0_i32 = arith.constant 0 : i32
    %c0_i32_0 = arith.constant 0 : i32
    %c0_i32_1 = arith.constant 0 : i32
    return %c0_i32, %c0_i32_0 : i32, i32
  }
  func.func @transform_4(%arg0: i32) -> (i32, i32) {
    %c0_i32 = arith.constant 0 : i32
    %c0_i32_0 = arith.constant 0 : i32
    %c0_i32_1 = arith.constant 0 : i32
    return %c0_i32, %c0_i32_0 : i32, i32
  }
  func.func @transform_5(%arg0: i32) -> (i32, i32) {
    %c0_i32 = arith.constant 0 : i32
    %c0_i32_0 = arith.constant 0 : i32
    %c0_i32_1 = arith.constant 0 : i32
    return %c0_i32, %c0_i32_0 : i32, i32
  }
  func.func @transform_6(%arg0: i32) -> (i32, i32) {
    %c0_i32 = arith.constant 0 : i32
    %c0_i32_0 = arith.constant 0 : i32
    return %arg0, %c0_i32 : i32, i32
  }
}

module attributes {stable_mosaic.version = 11 : i64} {
  func.func @textcnn_kernel(%arg0: i32, %arg1: memref<32x16x128xbf16, #tpu.memory_space<vmem>>, %arg2: memref<128x128xbf16, #tpu.memory_space<vmem>>, %arg3: memref<1x128xf32, #tpu.memory_space<vmem>>, %arg4: memref<16x128xbf16, #tpu.memory_space<vmem>>, %arg5: memref<128x128xbf16, #tpu.memory_space<vmem>>, %arg6: memref<1x128xf32, #tpu.memory_space<vmem>>, %arg7: memref<32x128xf32, #tpu.memory_space<vmem>>) attributes {dimension_semantics = [#tpu.dimension_semantics<parallel>], iteration_bounds = array<i64: 2>, scalar_prefetch = 0 : i64, scratch_operands = 0 : i64, tpu.core_type = #tpu.core_type<tc>, window_params = [{transform_indices = @transform_0, window_bounds = array<i64: 32, 16, 128>}, {pipeline_mode = #tpu.pipeline_mode<synchronous>, transform_indices = @transform_1, window_bounds = array<i64: 128, 128>}, {pipeline_mode = #tpu.pipeline_mode<synchronous>, transform_indices = @transform_2, window_bounds = array<i64: 1, 128>}, {pipeline_mode = #tpu.pipeline_mode<synchronous>, transform_indices = @transform_3, window_bounds = array<i64: 16, 128>}, {pipeline_mode = #tpu.pipeline_mode<synchronous>, transform_indices = @transform_4, window_bounds = array<i64: 128, 128>}, {pipeline_mode = #tpu.pipeline_mode<synchronous>, transform_indices = @transform_5, window_bounds = array<i64: 1, 128>}, {transform_indices = @transform_6, window_bounds = array<i64: 32, 128>}]} {
    %c0 = arith.constant 0 : index
    %c0_0 = arith.constant 0 : index
    %c0_1 = arith.constant 0 : index
    %0 = vector.load %arg1[%c0, %c0_0, %c0_1] : memref<32x16x128xbf16, #tpu.memory_space<vmem>>, vector<32x16x128xbf16>
    %1 = vector.shape_cast %0 : vector<32x16x128xbf16> to vector<512x128xbf16>
    %c0_2 = arith.constant 0 : index
    %c0_3 = arith.constant 0 : index
    %2 = vector.load %arg2[%c0_2, %c0_3] : memref<128x128xbf16, #tpu.memory_space<vmem>>, vector<128x128xbf16>
    %cst = arith.constant dense<0.000000e+00> : vector<512x128xf32>
    %3 = tpu.matmul %1, %2, %cst {dimension_numbers = #tpu.dot_dimension_numbers<[1], [0], [0], [1], [0, 0, 1, 1], [], []>} : vector<512x128xbf16>, vector<128x128xbf16>, vector<512x128xf32> -> vector<512x128xf32>
    %4 = vector.shape_cast %3 : vector<512x128xf32> to vector<32x16x128xf32>
    %c0_4 = arith.constant 0 : index
    %c0_5 = arith.constant 0 : index
    %5 = vector.load %arg4[%c0_4, %c0_5] : memref<16x128xbf16, #tpu.memory_space<vmem>>, vector<16x128xbf16>
    %6 = arith.extf %5 : vector<16x128xbf16> to vector<16x128xf32>
    %7 = vector.shape_cast %6 : vector<16x128xf32> to vector<1x16x128xf32>
    %8 = vector.broadcast %7 : vector<1x16x128xf32> to vector<32x16x128xf32>
    %9 = arith.addf %4, %8 : vector<32x16x128xf32>
    %cst_6 = arith.constant dense<0xFF800000> : vector<32x128xf32>
    %10 = vector.multi_reduction <maximumf>, %9, %cst_6 [1] : vector<32x16x128xf32> to vector<32x128xf32>
    %c0_7 = arith.constant 0 : index
    %c0_8 = arith.constant 0 : index
    %11 = vector.load %arg3[%c0_7, %c0_8] : memref<1x128xf32, #tpu.memory_space<vmem>>, vector<1x128xf32>
    %12 = vector.broadcast %11 : vector<1x128xf32> to vector<32x128xf32>
    %13 = arith.addf %10, %12 : vector<32x128xf32>
    %cst_9 = arith.constant 0.000000e+00 : f32
    %14 = vector.broadcast %cst_9 : f32 to vector<32x128xf32>
    %15 = arith.maximumf %13, %14 : vector<32x128xf32>
    %16 = arith.truncf %15 : vector<32x128xf32> to vector<32x128xbf16>
    %c0_10 = arith.constant 0 : index
    %c0_11 = arith.constant 0 : index
    %17 = vector.load %arg5[%c0_10, %c0_11] : memref<128x128xbf16, #tpu.memory_space<vmem>>, vector<128x128xbf16>
    %cst_12 = arith.constant dense<0.000000e+00> : vector<32x128xf32>
    %18 = tpu.matmul %16, %17, %cst_12 {dimension_numbers = #tpu.dot_dimension_numbers<[1], [0], [0], [1], [0, 0, 1, 1], [], []>} : vector<32x128xbf16>, vector<128x128xbf16>, vector<32x128xf32> -> vector<32x128xf32>
    %c0_13 = arith.constant 0 : index
    %c0_14 = arith.constant 0 : index
    %19 = vector.load %arg6[%c0_13, %c0_14] : memref<1x128xf32, #tpu.memory_space<vmem>>, vector<1x128xf32>
    %20 = vector.broadcast %19 : vector<1x128xf32> to vector<32x128xf32>
    %21 = arith.addf %18, %20 : vector<32x128xf32>
    %c0_15 = arith.constant 0 : index
    %c0_16 = arith.constant 0 : index
    %22 = vector.load %arg7[%c0_15, %c0_16] : memref<32x128xf32, #tpu.memory_space<vmem>>, vector<32x128xf32>
    tpu.vector_store %arg7[%c0_15, %c0_16], %21 {strides = array<i32>} : memref<32x128xf32, #tpu.memory_space<vmem>>, vector<32x128xf32>,
    return
  }
  func.func @transform_0(%arg0: i32) -> (i32, i32, i32) {
    %c0_i32 = arith.constant 0 : i32
    %c0_i32_0 = arith.constant 0 : i32
    %c0_i32_1 = arith.constant 0 : i32
    return %arg0, %c0_i32, %c0_i32_0 : i32, i32, i32
  }
  func.func @transform_1(%arg0: i32) -> (i32, i32) {
    %c0_i32 = arith.constant 0 : i32
    %c0_i32_0 = arith.constant 0 : i32
    %c0_i32_1 = arith.constant 0 : i32
    return %c0_i32, %c0_i32_0 : i32, i32
  }
  func.func @transform_2(%arg0: i32) -> (i32, i32) {
    %c0_i32 = arith.constant 0 : i32
    %c0_i32_0 = arith.constant 0 : i32
    %c0_i32_1 = arith.constant 0 : i32
    return %c0_i32, %c0_i32_0 : i32, i32
  }
  func.func @transform_3(%arg0: i32) -> (i32, i32) {
    %c0_i32 = arith.constant 0 : i32
    %c0_i32_0 = arith.constant 0 : i32
    %c0_i32_1 = arith.constant 0 : i32
    return %c0_i32, %c0_i32_0 : i32, i32
  }
  func.func @transform_4(%arg0: i32) -> (i32, i32) {
    %c0_i32 = arith.constant 0 : i32
    %c0_i32_0 = arith.constant 0 : i32
    %c0_i32_1 = arith.constant 0 : i32
    return %c0_i32, %c0_i32_0 : i32, i32
  }
  func.func @transform_5(%arg0: i32) -> (i32, i32) {
    %c0_i32 = arith.constant 0 : i32
    %c0_i32_0 = arith.constant 0 : i32
    %c0_i32_1 = arith.constant 0 : i32
    return %c0_i32, %c0_i32_0 : i32, i32
  }
  func.func @transform_6(%arg0: i32) -> (i32, i32) {
    %c0_i32 = arith.constant 0 : i32
    %c0_i32_0 = arith.constant 0 : i32
    return %arg0, %c0_i32 : i32, i32
  }
}

</mosaic_0001>

<bundles_post_ra>
// kernel: tpu_custom_call.1
= control target key start
LH: loop header
LB: loop body
LE: loop exit
PB: predicated region body
PF: predicated region fallthrough
CT: control target
= control target key end

     0   :  { %11 = vsyncpa [#allocation3], 0  ;;  %s2858_s0 = inlined_call_operand.hbm [shape: bf16[64,16,128], index: 0, kind: input, shape index: {}]   ;;  %s2859_s1 = inlined_call_operand.hbm [shape: bf16[128,128], index: 1, kind: input, shape index: {}]   ;;  %s2860_s2 = inlined_call_operand.vmem [shape: f32[1,128], index: 2, kind: input, shape index: {}]   ;;  %s2861_s3 = inlined_call_operand.hbm [shape: bf16[16,128], index: 3, kind: input, shape index: {}]   ;;  %s2862_s4 = inlined_call_operand.hbm [shape: bf16[128,128], index: 4, kind: input, shape index: {}]   ;;  %s2863_s5 = inlined_call_operand.vmem [shape: f32[1,128], index: 5, kind: input, shape index: {}]   ;;  %s2864_s6 = inlined_call_operand.hbm [shape: f32[64,128], index: 6, kind: output, shape index: {}]  }
   0x1   :  { %13 = vsyncpa [#allocation3 + $0x1], 0 }
   0x2   :  { %14 = vsyncpa [#allocation6], 0 }
   0x3   :  { %15 = vsyncpa [#allocation9], 0 }
   0x4   :  { %16 = vsyncpa [#allocation4], 0 }
   0x5   :  { %18 = vsyncpa [#allocation4 + $0x1], 0  ;;  %s2290_s21 = smov 0   ;;  %s2292_s22 = smov 0  }
   0x6   :  { %s2294_s23 = smov 0   ;;  %s2296_s24 = smov 0  }
   0x7 LB: > { %s2311_s25 = sadd.s32 4294967295, %s2244_s24   ;;  %s1693_s26 = sadd.s32 4294967294, %s2244_s24   ;;  %s2244_s24 = sphi %s2296_s24, %s2891_s24   ;;  %s2240_s23 = sphi %s2294_s23, %s2890_s23   ;;  %s2236_s22 = sphi %s2292_s22, %s2889_s22   ;;  %s2232_s21 = sphi %s2290_s21, %s2888_s21  }
   0x8   : > { %p44_p0 = scmp.ne.s32.totalorder %s2236_s22, %s2232_s21  ;;  %p2865_p1 = scmp.eq.s32.totalorder %s2311_s25, 0 }
   0x9   : > { %p173_p2 = scmp.eq.s32.totalorder %s2311_s25, 1  ;;  %p179_p3 = scmp.eq.s32.totalorder %s1693_s26, 1 }
   0xa   : > { %p2320_p4 = por %p2865_p1, %p44_p0  ;;  %p1694_p5 = scmp.ge.s32.totalorder %s2244_s24, 1 }
   0xb   : > { %p2325_p6 = por %p179_p3, %p44_p0  ;;  %p186_p7 = scmp.lt.s32.totalorder %s2244_s24, 3 }
   0xc   : > { %s2871_s27 = scalar_select %p2320_p4, 1, 0 }
   0xd   : > { %s2872_s28 = scalar_select %p2325_p6, 1, 0 }
   0xe   : > { %p2330_p8 = pnand %p1694_p5, %p186_p7  ;;  %s2246_s30 = smov [#allocation5]  }
   0xf   : > { %s198_s7 = sshll.u32 %s2246_s30, 4  ;;  %s2247_s9 = smov [#allocation7]   ;;  %s199_s7 = int_to_ptr.vmem [resolvable:$true] %s198_s7 }
  0x10   : > { %s2873_s29 = scalar_select %p2330_p8, 1, 0 }
  0x11   : > { %p1953_p9 = pneg %p2330_p8  ;;  %s214_s10 = sshll.u32 %s2247_s9, 4  ;;  %s215_s10 = int_to_ptr.vmem [resolvable:$true] %s214_s10 }
  0x12   : > { %s2248_s11 = smov [#allocation8]   ;;  %s2077_s13 = scalar_lea.vmem %s199_s7, 1024 }
  0x13   : > { %p2339_p11 = pnand %p1953_p9, %p2865_p1  ;;  %s227_s12 = sshll.u32 %s2248_s11, 4  ;;  %s228_s12 = int_to_ptr.vmem [resolvable:$true] %s227_s12 }
  0x14   : > { %p2078_p13 = scmp.ne.s32.totalorder %s199_s7, %s2077_s13  ;;  %p2085_p5 = scmp.lt.s32.totalorder %s199_s7, %s199_s7 }
  0x15   : > { %p2068_p12 = pneg %p2339_p11  ;;  %p2086_p7 = scmp.lt.s32.totalorder %s2077_s13, %s2077_s13 }
  0x17   : > { %p2080_p0 = pnand %p2078_p13, %p2068_p12  ;;  %p2087_p9 = por %p2086_p7, %p2085_p5 }
  0x19   : > { %p2081_p3 = pneg %p2080_p0 }
  0x1b   : > { %p2088_p10 = pnand %p2087_p9, %p2081_p3 }
  0x1d   : > { %2091 = shalt.err (!%p2088_p10)
}
  0x1e   : > { %s2866_s14 = smov 64   ;;  %s2867_s15 = smov 4  }
  0x1f   : > { %1956 = dma.hbm_to_vmem [thread:$0]  (!%p2339_p11), %s2859_s1, 1024, %s199_s7, [#allocation6], %s2866_s14, %s2866_s14, %s2867_s15  }
  0x20   : > { %s2103_s18 = scalar_lea.vmem %s215_s10, 128  ;;  %p2111_p3 = scmp.lt.s32.totalorder %s215_s10, %s215_s10 }
  0x21   : > { %p2104_p13 = scmp.ne.s32.totalorder %s215_s10, %s2103_s18  ;;  %p2112_p10 = scmp.lt.s32.totalorder %s2103_s18, %s2103_s18 }
  0x23   : > { %p2106_p0 = pnand %p2104_p13, %p2068_p12  ;;  %p2113_p7 = por %p2112_p10, %p2111_p3 }
  0x25   : > { %p2107_p5 = pneg %p2106_p0 }
  0x27   : > { %p2114_p9 = pnand %p2113_p7, %p2107_p5 }
  0x29   : > { %2117 = shalt.err (!%p2114_p9)
}
  0x2a   : > { %1959 = dma.hbm_to_vmem [thread:$0]  (!%p2339_p11), %s2861_s3, 128, %s215_s10, [#allocation6], %s2866_s14, %s2866_s14, %s2867_s15  }
  0x2b   : > { %s2129_s26 = scalar_lea.vmem %s228_s12, 1024  ;;  %p2137_p3 = scmp.lt.s32.totalorder %s228_s12, %s228_s12 }
  0x2c   : > { %p2130_p1 = scmp.ne.s32.totalorder %s228_s12, %s2129_s26  ;;  %p2138_p5 = scmp.lt.s32.totalorder %s2129_s26, %s2129_s26 }
  0x2e   : > { %p2132_p13 = pnand %p2130_p1, %p2068_p12  ;;  %p2139_p10 = por %p2138_p5, %p2137_p3 }
  0x30   : > { %p2133_p0 = pneg %p2132_p13 }
  0x32   : > { %p2140_p7 = pnand %p2139_p10, %p2133_p0 }
  0x34   : > { %2143 = shalt.err (!%p2140_p7)
}
  0x35   : > { %1962 = dma.hbm_to_vmem [thread:$0]  (!%p2339_p11), %s2862_s4, 1024, %s228_s12, [#allocation9], %s2866_s14, %s2866_s14, %s2867_s15  }
  0x36   : > { %s2379_s9 = sadd.s32 1, %s2244_s24   ;;  %s31_s10 = sadd.s32 1, %s2240_s23 }
  0x37   : > { %s28_s8 = ssub.s32 %s2244_s24, %s2379_s9  ;;  %p38_p12 = scmp.ne.s32.totalorder %s2240_s23, %s2236_s22 }
  0x38   : > { %p29_p1 = scmp.eq.s32.totalorder %s28_s8, 0  ;;  %p39_p9 = scmp.eq.s32.totalorder %s2244_s24, 0 }
  0x39   : > { %p1974_p13 = scmp.lt.s32.totalorder %s2244_s24, 2  ;;  %p2393_p3 = por %p173_p2, %p38_p12 }
  0x3a   : > { %s2389_s11 = scalar_select %p29_p1, %s2240_s23, %s31_s10  }
  0x3b   : > { %p40_p0 = por %p39_p9, %p38_p12  ;;  %s244_s16 = sand.u32 1, %s2240_s23  }
  0x3c   : > { %s2875_s13 = scalar_select %p2393_p3, 1, 0 }
  0x3d   : > { %s1765_s17 = sshll.u32 %s2244_s24, 12  ;;  %s1699_s12 = sshll.u32 %s244_s16, 8 }
  0x3e   : > { %s2402_s20 = scalar_lea.hbm %s2858_s0, %s1765_s17  ;;  %s248_s26 = scalar_lea.vmem [#allocation2], %s1699_s12 }
  0x3f   : > { %s256_s30 = sshll.u32 %s248_s26, 4  ;;  %p2404_p11 = pnand %p1974_p13, %p40_p0  ;;  %s2408_s30 = int_to_ptr.vmem [resolvable:$true] %s256_s30 }
  0x40   : > { %s2410_s8 = scalar_lea.sflag [#allocation3], %s244_s16  ;;  %s2144_s10 = scalar_lea.hbm %s2402_s20, 4096 }
  0x41   : > { %p2145_p2 = scmp.ne.s32.totalorder %s2402_s20, %s2144_s10  ;;  %p2146_p5 = pneg %p2404_p11 }
  0x42   : > { %s2149_s12 = scalar_lea.hbm %s2858_s0, 8192  ;;  %p2150_p1 = scmp.lt.s32.totalorder %s2402_s20, %s2858_s0 }
  0x43   : > { %p2147_p10 = pnand %p2146_p5, %p2145_p2  ;;  %p2151_p12 = scmp.lt.s32.totalorder %s2149_s12, %s2144_s10 }
  0x45   : > { %p2148_p7 = pneg %p2147_p10  ;;  %p2152_p9 = por %p2151_p12, %p2150_p1 }
  0x47   : > { %p2153_p13 = pnand %p2152_p9, %p2148_p7 }
  0x49   : > { %2156 = shalt.err (!%p2153_p13)
}
  0x4a   : > { %s2157_s16 = scalar_lea.vmem %s2408_s30, 4096  ;;  %s2251_s14 = smov [#allocation2]  }
  0x4b   : > { %p2158_p0 = scmp.ne.s32.totalorder %s2408_s30, %s2157_s16  ;;  %s2162_s15 = sshll.u32 %s2251_s14, 4  ;;  %s2163_s15 = int_to_ptr.vmem [resolvable:$false] %s2162_s15 }
  0x4c   : > { %s2164_s17 = scalar_lea.vmem %s2163_s15, 8192  ;;  %p2165_p10 = scmp.lt.s32.totalorder %s2408_s30, %s2163_s15 }
  0x4d   : > { %p2160_p6 = pnand %p2158_p0, %p2146_p5  ;;  %p2166_p3 = scmp.lt.s32.totalorder %s2164_s17, %s2157_s16 }
  0x4f   : > { %p2161_p2 = pneg %p2160_p6  ;;  %p2167_p4 = por %p2166_p3, %p2165_p10 }
  0x51   : > { %p2168_p8 = pnand %p2167_p4, %p2161_p2 }
  0x53   : > { %2171 = shalt.err (!%p2168_p8)
}
  0x54   : > { %s2877_s10 = smov 4   ;;  %s2878_s18 = smov 64  }
  0x55   : > { %1966 = dma.hbm_to_vmem [thread:$0]  (!%p2404_p11), %s2402_s20, 4096, %s2408_s30, %s2410_s8, %s2878_s18, %s2878_s18, %s2877_s10  }
  0x56   : > { %p2879_p6 = scmp.ne.s32.totalorder %s2873_s29, 0 }
  0x57   : > { %s2437_s14 = sand.u32 (!%p2879_p6), 1, %s2236_s22   ;;  %p2880_p4 = scmp.ne.s32.totalorder (!%p2879_p6), %s2871_s27, 0 }
  0x58   : > { %268 = sbr.rel (%p2879_p6) target bundleno = 672 (0x2a0), region = 44  ;;  %s1704_s15 = sshll.u32 (!%p2879_p6), %s2437_s14, 8 }
  0x59   : > { %s271_s12 = scalar_lea.sflag (!%p2879_p6), [#allocation3], %s2437_s14  ;;  %s2441_s19 = scalar_lea.vmem (!%p2879_p6), [#allocation2], %s1704_s15 }
  0x5d   : > { %2215 = dma.done.wait (%p2880_p4), %s271_s12, 4096  }
  0x5e   : > { %2217 = vsyncadd (%p2880_p4), %s271_s12, 4294963200  ;;  %p2881_p8 = scmp.eq.s32.totalorder %s2311_s25, 0 }
  0x60   : > { %2219 = dma.done.wait (%p2881_p8), [#allocation6], 1152   ;;  %p2882_p3 = pmov %p2881_p8 }
  0x62   : > { %2221 = vsyncadd (%p2882_p3), [#allocation6], 4294966144  ;;  %p2883_p11 = pmov %p2882_p3 }
  0x63   : > { %p2884_p5 = pmov %p2882_p3 }
  0x64   : > { %2223 = dma.done.wait (%p2883_p11), [#allocation9], 1024  }
  0x65   : > { %2225 = vsyncadd (%p2884_p5), [#allocation9], 4294966272  ;;  %v2018_v0 = vld [vmem:[#allocation5 + $0x38] sm:$0xff]   ;;  %v2019_v1 = vld [vmem:[#allocation5 + $0x30] sm:$0xff]   ;;  %vm1410_vm0 = vcmask 1041409   ;;  %vm1413_vm1 = vcmask 1042434  }
  0x66   : > { %1821 = vmatprep.subr.bf16.mxu0 %v2018_v0  ;;  %1921 = vmatprep.subr.bf16.mxu1 %v2018_v0  ;;  %v2020_v2 = vld [vmem:[#allocation5 + $0x28] sm:$0xff]   ;;  %v2021_v3 = vld [vmem:[#allocation5 + $0x20] sm:$0xff]   ;;  %v2027_v5 = vld [vmem:[%s2441_s19 + $0x90] sm:$0xff]   ;;  %vm1416_vm2 = vcmask 1043459   ;;  %vm1419_vm3 = vcmask 1044484   ;;  %vm1422_vm4 = vcmask 1045509  }
  0x67   : > { %1822 = vmatpush3.bf16.msra.mxu0 %v2018_v0  ;;  %1929 = vmatpush3.bf16.msra.mxu1 %v2018_v0  ;;  %v2026_v4 = vld [vmem:[%s2441_s19] sm:$0xff]   ;;  %v2022_v6 = vld [vmem:[#allocation5 + $0x18] sm:$0xff]   ;;  %v2023_v7 = vld [vmem:[#allocation5 + $0x10] sm:$0xff]   ;;  %vm1425_vm5 = vcmask 1046534   ;;  %vm1428_vm6 = vcmask 1047559   ;;  %s1708_s20 = sshll.u32 %s2437_s14, 5 }
  0x68   : > { %1823 = vmatprep.subr.bf16.mxu0 %v2019_v1  ;;  %1922 = vmatprep.subr.bf16.mxu1 %v2019_v1  ;;  %v2024_v8 = vld [vmem:[#allocation5 + $0x8] sm:$0xff]   ;;  %v2025_v9 = vld [vmem:[#allocation5] sm:$0xff]   ;;  %v2029_v11 = vld [vmem:[%s2441_s19 + $0x98] sm:$0xff]   ;;  %s314_s8 = scalar_lea.vmem [#allocation10], %s1708_s20  ;;  %s1766_s16 = sshll.u32 %s2311_s25, 9 }
  0x69   : > { %1837 = vmatprep.mubr.bf16.mxu0 %v2026_v4  ;;  %1873 = vmatprep.mubr.bf16.mxu1 %v2027_v5  ;;  %v2028_v10 = vld [vmem:[%s2441_s19 + $0x8] sm:$0xff]   ;;  %v2030_v12 = vld [vmem:[%s2441_s19 + $0x10] sm:$0xff]   ;;  %v2031_v13 = vld [vmem:[%s2441_s19 + $0xa0] sm:$0xff]   ;;  %s1591_s26 = sshll.u32 %s314_s8, 4  ;;  %s2815_s18 = scalar_lea.hbm %s2864_s6, %s1766_s16  ;;  %s2810_s26 = int_to_ptr.vmem [resolvable:$true] %s1591_s26 }
  0x6a   : > { %v2032_v14 = vld [vmem:[%s2441_s19 + $0x18] sm:$0xff]   ;;  %v2033_v15 = vld [vmem:[%s2441_s19 + $0xa8] sm:$0xff]   ;;  %v2034_v16 = vld [vmem:[%s2441_s19 + $0x20] sm:$0xff]   ;;  %s1578_s15 = scalar_lea.sflag [#allocation4], %s2437_s14  ;;  %s2172_s12 = scalar_lea.vmem %s2810_s26, 512 }
  0x6b   : > { %1824 = vmatpush3.bf16.msra.mxu0 %v2019_v1  ;;  %1930 = vmatpush3.bf16.msra.mxu1 %v2019_v1  ;;  %v2035_v17 = vld [vmem:[%s2441_s19 + $0xb0] sm:$0xff]   ;;  %v2036_v18 = vld [vmem:[%s2441_s19 + $0x28] sm:$0xff]   ;;  %v2037_v19 = vld [vmem:[%s2441_s19 + $0xb8] sm:$0xff]   ;;  %p2173_p7 = scmp.ne.s32.totalorder %s2810_s26, %s2172_s12  ;;  %p2885_p1 = scmp.ne.s32.totalorder %s2875_s13, 0 }
  0x6c   : > { %1825 = vmatprep.subr.bf16.mxu0 %v2020_v2  ;;  %1923 = vmatprep.subr.bf16.mxu1 %v2020_v2  ;;  %v2038_v20 = vld [vmem:[%s2441_s19 + $0x30] sm:$0xff]   ;;  %v2039_v21 = vld [vmem:[%s2441_s19 + $0xc0] sm:$0xff]   ;;  %v2040_v22 = vld [vmem:[%s2441_s19 + $0x38] sm:$0xff]   ;;  %s2252_s25 = smov [#allocation10]  }
  0x6d   : > { %v2041_v23 = vld [vmem:[%s2441_s19 + $0xc8] sm:$0xff]   ;;  %v2042_v24 = vld [vmem:[%s2441_s19 + $0x40] sm:$0xff]   ;;  %v2043_v25 = vld [vmem:[%s2441_s19 + $0xd0] sm:$0xff]   ;;  %p2174_p12 = pnand %p2173_p7, %p2885_p1 }
  0x6e   : > { %v2044_v26 = vld [vmem:[%s2441_s19 + $0x48] sm:$0xff]   ;;  %v2045_v27 = vld [vmem:[%s2441_s19 + $0xd8] sm:$0xff]   ;;  %v2046_v28 = vld [vmem:[%s2441_s19 + $0x50] sm:$0xff]  }
  0x6f   : > { %1826 = vmatpush3.bf16.msra.mxu0 %v2020_v2  ;;  %1931 = vmatpush3.bf16.msra.mxu1 %v2020_v2  ;;  %v2047_v29 = vld [vmem:[%s2441_s19 + $0xe0] sm:$0xff]   ;;  %v2048_v30 = vld [vmem:[%s2441_s19 + $0x58] sm:$0xff]   ;;  %v2049_v31 = vld [vmem:[%s2441_s19 + $0xe8] sm:$0xff]   ;;  %p2175_p9 = pneg %p2174_p12 }
  0x70   : > { %1827 = vmatprep.subr.bf16.mxu0 %v2021_v3  ;;  %1924 = vmatprep.subr.bf16.mxu1 %v2021_v3  ;;  %v2050_v32 = vld [vmem:[%s2441_s19 + $0x60] sm:$0xff]   ;;  %v2051_v33 = vld [vmem:[%s2441_s19 + $0xf0] sm:$0xff]   ;;  %v2052_v34 = vld [vmem:[%s2441_s19 + $0x68] sm:$0xff]  }
  0x71   : > { %v2053_v35 = vld [vmem:[%s2441_s19 + $0xf8] sm:$0xff]   ;;  %v2054_v36 = vld [vmem:[%s2441_s19 + $0x70] sm:$0xff]   ;;  %v2056_v38 = vld [vmem:[%s2441_s19 + $0x80] sm:$0xff]  }
  0x72   : > { %v2055_v37 = vld [vmem:[%s2441_s19 + $0x78] sm:$0xff]   ;;  %v2057_v39 = vld [vmem:[%s2441_s19 + $0x88] sm:$0xff]   ;;  %v2058_v40 = vld [vmem:[#allocation8 + $0x38] sm:$0xff]   ;;  %s2176_s19 = sshll.u32 %s2252_s25, 4  ;;  %s2177_s19 = int_to_ptr.vmem [resolvable:$false] %s2176_s19 }
  0x73   : > { %1828 = vmatpush3.bf16.msra.mxu0 %v2021_v3  ;;  %1932 = vmatpush3.bf16.msra.mxu1 %v2021_v3  ;;  %v2059_v41 = vld [vmem:[#allocation8 + $0x30] sm:$0xff]   ;;  %v2060_v42 = vld [vmem:[#allocation8 + $0x28] sm:$0xff]   ;;  %v2061_v43 = vld [vmem:[#allocation8 + $0x20] sm:$0xff]   ;;  %s2178_s27 = scalar_lea.vmem %s2177_s19, 1024  ;;  %p2179_p13 = scmp.lt.s32.totalorder %s2810_s26, %s2177_s19 }
  0x74   : > { %1829 = vmatprep.subr.bf16.mxu0 %v2022_v6  ;;  %1925 = vmatprep.subr.bf16.mxu1 %v2022_v6  ;;  %v2062_v44 = vld [vmem:[#allocation8 + $0x18] sm:$0xff]   ;;  %v2063_v45 = vld [vmem:[#allocation8 + $0x10] sm:$0xff]   ;;  %v2064_v47 = vld [vmem:[#allocation8 + $0x8] sm:$0xff]   ;;  %p2180_p0 = scmp.lt.s32.totalorder %s2178_s27, %s2172_s12 }
  0x75   : > { %v1768_v46 = vld [vmem:[#allocation7] sm:$0xff]   ;;  %v2065_v55 = vld [vmem:[#allocation8] sm:$0xff]  }
  0x76   : > { %v2487_v50 = vunpack.c.l.bf16 %v1768_v46  ;;  %v2489_v51 = vunpack.c.h.bf16 %v1768_v46  ;;  %p2181_p2 = por %p2180_p0, %p2179_p13 }
  0x77   : > { %1830 = vmatpush3.bf16.msra.mxu0 %v2022_v6  ;;  %1933 = vmatpush3.bf16.msra.mxu1 %v2022_v6 }
  0x78   : > { %1831 = vmatprep.subr.bf16.mxu0 %v2023_v7  ;;  %1926 = vmatprep.subr.bf16.mxu1 %v2023_v7  ;;  %p2182_p10 = pnand %p2181_p2, %p2175_p9 }
  0x7b   : > { %1832 = vmatpush3.bf16.msra.mxu0 %v2023_v7  ;;  %1934 = vmatpush3.bf16.msra.mxu1 %v2023_v7 }
  0x7c   : > { %1833 = vmatprep.subr.bf16.mxu0 %v2024_v8  ;;  %1927 = vmatprep.subr.bf16.mxu1 %v2024_v8 }
  0x7f   : > { %1834 = vmatpush3.bf16.msra.mxu0 %v2024_v8  ;;  %1935 = vmatpush3.bf16.msra.mxu1 %v2024_v8 }
  0x80   : > { %1835 = vmatprep.subr.bf16.mxu0 %v2025_v9  ;;  %1928 = vmatprep.subr.bf16.mxu1 %v2025_v9 }
  0x83   : > { %1836 = vmatpush3.bf16.msra.mxu0 %v2025_v9  ;;  %1936 = vmatpush3.bf16.msra.mxu1 %v2025_v9 }
  0x84   : > { %1901 = vmatprep.subr.bf16.mxu1 %v2058_v40 }
  0x86   : > { %1838 = vmatmul.mubr.bf16.vlgmr.msra.gmra.mxu0 %v2028_v10  ;;  %1874 = vmatmul.mubr.bf16.vlgmr.msra.gmra.mxu1 %v2029_v11 }
  0x87   : > { %1841 = vmatprep.mubr.bf16.mxu0 %v2030_v12  ;;  %1877 = vmatprep.mubr.bf16.mxu1 %v2031_v13 }
  0x88   : > { %1902 = vmatpush3.bf16.msra.mxu1 %v2058_v40 }
  0x89   : > { %1903 = vmatprep.subr.bf16.mxu1 %v2059_v41 }
  0x8c   : > { %1904 = vmatpush3.bf16.msra.mxu1 %v2059_v41 }
  0x8d   : > { %1905 = vmatprep.subr.bf16.mxu1 %v2060_v42 }
  0x8e   : > { %1842 = vmatmul.mubr.bf16.gmra.mxu0 %v2032_v14  ;;  %1878 = vmatmul.mubr.bf16.gmra.mxu1 %v2033_v15 }
  0x8f   : > { %1845 = vmatprep.mubr.bf16.mxu0 %v2034_v16  ;;  %1881 = vmatprep.mubr.bf16.mxu1 %v2035_v17 }
  0x90   : > { %1906 = vmatpush3.bf16.msra.mxu1 %v2060_v42 }
  0x91   : > { %1907 = vmatprep.subr.bf16.mxu1 %v2061_v43 }
  0x94   : > { %1908 = vmatpush3.bf16.msra.mxu1 %v2061_v43 }
  0x95   : > { %1909 = vmatprep.subr.bf16.mxu1 %v2062_v44 }
  0x96   : > { %1846 = vmatmul.mubr.bf16.gmra.mxu0 %v2036_v18  ;;  %1882 = vmatmul.mubr.bf16.gmra.mxu1 %v2037_v19 }
  0x97   : > { %1849 = vmatprep.mubr.bf16.mxu0 %v2038_v20  ;;  %1885 = vmatprep.mubr.bf16.mxu1 %v2039_v21 }
  0x98   : > { %1910 = vmatpush3.bf16.msra.mxu1 %v2062_v44 }
  0x99   : > { %1911 = vmatprep.subr.bf16.mxu1 %v2063_v45 }
  0x9c   : > { %1912 = vmatpush3.bf16.msra.mxu1 %v2063_v45  ;;  %v2514_v45 = vld [vmem:[%s2860_s2] ss:$0 sm:$0xff] }
  0x9d   : > { %1913 = vmatprep.subr.bf16.mxu1 %v2064_v47 }
  0x9e   : > { %1850 = vmatmul.mubr.bf16.gmra.mxu0 %v2040_v22  ;;  %1886 = vmatmul.mubr.bf16.gmra.mxu1 %v2041_v23 }
  0x9f   : > { %1853 = vmatprep.mubr.bf16.mxu0 %v2042_v24  ;;  %1889 = vmatprep.mubr.bf16.mxu1 %v2043_v25 }
  0xa0   : > { %1914 = vmatpush3.bf16.msra.mxu1 %v2064_v47 }
  0xa1   : > { %1915 = vmatprep.subr.bf16.mxu1 %v2065_v55 }
  0xa4   : > { %1916 = vmatpush3.bf16.msra.mxu1 %v2065_v55 }
  0xa6   : > { %1854 = vmatmul.mubr.bf16.gmra.mxu0 %v2044_v26  ;;  %1890 = vmatmul.mubr.bf16.gmra.mxu1 %v2045_v27 }
  0xa7   : > { %1857 = vmatprep.mubr.bf16.mxu0 %v2046_v28  ;;  %1893 = vmatprep.mubr.bf16.mxu1 %v2047_v29 }
  0xae   : > { %1858 = vmatmul.mubr.bf16.gmra.mxu0 %v2048_v30  ;;  %1894 = vmatmul.mubr.bf16.gmra.mxu1 %v2049_v31 }
  0xaf   : > { %1861 = vmatprep.mubr.bf16.mxu0 %v2050_v32  ;;  %1897 = vmatprep.mubr.bf16.mxu1 %v2051_v33 }
  0xb6   : > { %1862 = vmatmul.mubr.bf16.gmra.mxu0 %v2052_v34  ;;  %1898 = vmatmul.mubr.bf16.gmra.mxu1 %v2053_v35 }
  0xb7   : > { %1865 = vmatprep.mubr.bf16.mxu0 %v2054_v36 }
  0xbe   : > { %1866 = vmatmul.mubr.bf16.gmra.mxu0 %v2055_v37 }
  0xbf   : > { %1869 = vmatprep.mubr.bf16.mxu0 %v2056_v38 }
  0xc6   : > { %1870 = vmatmul.mubr.bf16.gmra.mxu0 %v2057_v39 }
 0x146   : > { %v1839_v48 = vpop.f32.mrf.mxu0  ;;  %v1875_v49 = vpop.f32.mrf.mxu1 }
 0x147   : > { %v969_v54 = vadd.f32 %v1875_v49, %v2487_v50  ;;  %v933_v58 = vadd.f32 %v1839_v48, %v2487_v50 }
 0x148   : > { %v672_v52 = vpop.f32.mrf.mxu0  ;;  %v816_v53 = vpop.f32.mrf.mxu1 }
 0x149   : > { %v967_v59 = vadd.f32 %v2487_v50, %v816_v53  ;;  %v931_v62 = vadd.f32 %v2487_v50, %v672_v52 }
 0x14a   : > { %v1840_v56 = vpop.f32.mrf.mxu0  ;;  %v1876_v57 = vpop.f32.mrf.mxu1 }
 0x14b   : > { %v934_v60 = vadd.f32 %v1840_v56, %v2489_v51  ;;  %v970_v61 = vadd.f32 %v1876_v57, %v2489_v51 }
 0x14c   : > { %v675_v63 = vpop.f32.mrf.mxu0  ;;  %v819_v0 = vpop.f32.mrf.mxu1 }
 0x14d   : > { %v1002_v1 = vmax.f32 %v933_v58, %v934_v60  ;;  %v1128_v2 = vmax.f32 %v969_v54, %v970_v61  ;;  %v932_v3 = vadd.f32 %v2489_v51, %v675_v63  ;;  %v968_v4 = vadd.f32 %v2489_v51, %v819_v0 }
 0x14e   : > { %v1843_v5 = vpop.f32.mrf.mxu0  ;;  %v1879_v6 = vpop.f32.mrf.mxu1 }
 0x14f   : > { %v1003_v7 = vrot.slane %v1002_v1, 4  ;;  %v1129_v8 = vrot.slane %v1128_v2, 4  ;;  %v995_v9 = vmax.f32 %v931_v62, %v932_v3  ;;  %v1121_v10 = vmax.f32 %v967_v59, %v968_v4 }
 0x150   : > { %v688_v11 = vpop.f32.mrf.mxu0  ;;  %v832_v12 = vpop.f32.mrf.mxu1  ;;  %v937_v17 = vadd.f32 %v1843_v5, %v2487_v50  ;;  %v973_v18 = vadd.f32 %v1879_v6, %v2487_v50 }
 0x151   : > { %v1004_v13 = vmax.f32 %v1002_v1, %v1003_v7  ;;  %v1130_v14 = vmax.f32 %v1128_v2, %v1129_v8  ;;  %v996_v15 = vrot.slane %v995_v9, 4  ;;  %v1122_v16 = vrot.slane %v1121_v10, 4 }
 0x152   : > { %v1844_v19 = vpop.f32.mrf.mxu0  ;;  %v1880_v20 = vpop.f32.mrf.mxu1  ;;  %v935_v25 = vadd.f32 %v2487_v50, %v688_v11  ;;  %v971_v26 = vadd.f32 %v2487_v50, %v832_v12 }
 0x153   : > { %v1005_v21 = vrot.slane %v1004_v13, 2  ;;  %v1131_v22 = vrot.slane %v1130_v14, 2  ;;  %v997_v23 = vmax.f32 %v995_v9, %v996_v15  ;;  %v1123_v24 = vmax.f32 %v1121_v10, %v1122_v16 }
 0x154   : > { %v938_v27 = vadd.f32 %v1844_v19, %v2489_v51  ;;  %v974_v28 = vadd.f32 %v1880_v20, %v2489_v51  ;;  %v691_v29 = vpop.f32.mrf.mxu0  ;;  %v835_v30 = vpop.f32.mrf.mxu1 }
 0x155   : > { %v1006_v31 = vmax.f32 %v1004_v13, %v1005_v21  ;;  %v1132_v32 = vmax.f32 %v1130_v14, %v1131_v22  ;;  %v998_v33 = vrot.slane %v997_v23, 2  ;;  %v1124_v34 = vrot.slane %v1123_v24, 2 }
 0x156   : > { %v1016_v35 = vmax.f32 %v937_v17, %v938_v27  ;;  %v1142_v36 = vmax.f32 %v973_v18, %v974_v28  ;;  %v936_v37 = vadd.f32 %v2489_v51, %v691_v29  ;;  %v972_v38 = vadd.f32 %v2489_v51, %v835_v30  ;;  %v2507_v39 = vpop.f32.mrf.mxu0  ;;  %v2509_v40 = vpop.f32.mrf.mxu1 }
 0x157   : > { %v1007_v41 = vrot.slane %v1006_v31, 1  ;;  %v1133_v42 = vrot.slane %v1132_v32, 1  ;;  %v999_v43 = vmax.f32 %v997_v23, %v998_v33  ;;  %v1125_v44 = vmax.f32 %v1123_v24, %v1124_v34 }
 0x158   : > { %v1017_v46 = vrot.slane %v1016_v35, 4  ;;  %v1143_v47 = vrot.slane %v1142_v36, 4  ;;  %v1009_v48 = vmax.f32 %v935_v25, %v936_v37  ;;  %v1135_v49 = vmax.f32 %v971_v26, %v972_v38  ;;  %v2516_v52 = vpop.f32.mrf.mxu0  ;;  %v848_v53 = vpop.f32.mrf.mxu1 }
 0x159   : > { %v1008_v54 = vmax.f32 %v1006_v31, %v1007_v41  ;;  %v1134_v55 = vmax.f32 %v1132_v32, %v1133_v42  ;;  %v1000_v56 = vrot.slane %v999_v43, 1  ;;  %v1126_v57 = vrot.slane %v1125_v44, 1 }
 0x15a   : > { %v1018_v58 = vmax.f32 %v1016_v35, %v1017_v46  ;;  %v1144_v59 = vmax.f32 %v1142_v36, %v1143_v47  ;;  %v1010_v60 = vrot.slane %v1009_v48, 4  ;;  %v1136_v61 = vrot.slane %v1135_v49, 4  ;;  %v1848_v62 = vpop.f32.mrf.mxu0  ;;  %v1884_v63 = vpop.f32.mrf.mxu1 }
 0x15b   : > { %v1227_v0 = vadd.f32 %v2514_v45, %v1008_v54  ;;  %v1245_v1 = vadd.f32 %v2514_v45, %v1134_v55  ;;  %v1001_v2 = vmax.f32 %v999_v43, %v1000_v56  ;;  %v1127_v3 = vmax.f32 %v1125_v44, %v1126_v57 }
 0x15c   : > { %v1019_v4 = vrot.slane %v1018_v58, 2  ;;  %v1145_v5 = vrot.slane %v1144_v59, 2  ;;  %v1011_v6 = vmax.f32 %v1009_v48, %v1010_v60  ;;  %v1137_v7 = vmax.f32 %v1135_v49, %v1136_v61  ;;  %v707_v8 = vpop.f32.mrf.mxu0  ;;  %v851_v9 = vpop.f32.mrf.mxu1 }
 0x15d   : > { %v1259_v10 = vmax.f32 %v1227_v0, 0.0  ;;  %v1277_v11 = vmax.f32 %v1245_v1, 0.0  ;;  %v1226_v12 = vadd.f32 %v2514_v45, %v1001_v2  ;;  %v1244_v13 = vadd.f32 %v2514_v45, %v1127_v3 }
 0x15e   : > { %v1020_v14 = vmax.f32 %v1018_v58, %v1019_v4  ;;  %v1146_v15 = vmax.f32 %v1144_v59, %v1145_v5  ;;  %v1012_v16 = vrot.slane %v1011_v6, 2  ;;  %v1138_v17 = vrot.slane %v1137_v7, 2  ;;  %v2522_v18 = vpop.f32.mrf.mxu0  ;;  %v2524_v19 = vpop.f32.mrf.mxu1 }
 0x15f   : > { %v1291_v20 = vpack.c.bf16 %v1259_v10, %v1259_v10  ;;  %v1258_v21 = vmax.f32 %v1226_v12, 0.0  ;;  %v1309_v28 = vpack.c.bf16 %v1277_v11, %v1277_v11  ;;  %v1276_v29 = vmax.f32 %v1244_v13, 0.0 }
 0x160   : > { %v1021_v22 = vrot.slane %v1020_v14, 1  ;;  %v1147_v23 = vrot.slane %v1146_v15, 1  ;;  %v1013_v24 = vmax.f32 %v1011_v6, %v1012_v16  ;;  %v1139_v25 = vmax.f32 %v1137_v7, %v1138_v17  ;;  %v2526_v26 = vpop.f32.mrf.mxu0  ;;  %v864_v30 = vpop.f32.mrf.mxu1 }
 0x161   : > { %v1378_v27 = vunpack.c.l.b16 %v1291_v20  ;;  %v1290_v36 = vpack.c.bf16 %v1258_v21, %v1258_v21  ;;  %v1396_v43 = vunpack.c.l.b16 %v1309_v28  ;;  %v977_v44 = vadd.f32 %v2509_v40, %v2487_v50 }
 0x162   : > { %v1022_v31 = vmax.f32 %v1020_v14, %v1021_v22  ;;  %v1148_v32 = vmax.f32 %v1146_v15, %v1147_v23  ;;  %v1014_v33 = vrot.slane %v1013_v24, 1  ;;  %v1140_v34 = vrot.slane %v1139_v25, 1  ;;  %v1852_v35 = vpop.f32.mrf.mxu0  ;;  %v1888_v46 = vpop.f32.mrf.mxu1 }
 0x163   : > { %v1409_v47 = vrot.slane %v1378_v27, 7  ;;  %v2534_v48 = vpack.c.bf16 %v1276_v29, %v1276_v29  ;;  %v941_v56 = vadd.f32 %v2507_v39, %v2487_v50  ;;  %v975_v57 = vadd.f32 %v2487_v50, %v848_v53 }
 0x164   : > { %v1229_v37 = vadd.f32 %v2514_v45, %v1022_v31  ;;  %v1247_v38 = vadd.f32 %v2514_v45, %v1148_v32  ;;  %v1015_v41 = vmax.f32 %v1013_v24, %v1014_v33  ;;  %v2530_v42 = vpop.f32.mrf.mxu0  ;;  %v1141_v54 = vmax.f32 %v1139_v25, %v1140_v34  ;;  %v867_v5 = vpop.f32.mrf.mxu1 }
 0x165   : > { %v942_v58 = vadd.f32 %v1848_v62, %v2489_v51  ;;  %v978_v59 = vadd.f32 %v1884_v63, %v2489_v51  ;;  %v1377_v60 = vunpack.c.l.b16 %v1290_v36  ;;  %v939_v0 = vadd.f32 %v2487_v50, %v2516_v52 }
 0x166   : > { %v1228_v49 = vadd.f32 %v2514_v45, %v1015_v41  ;;  %v2537_v55 = vpop.f32.mrf.mxu0  ;;  %v1261_v40 = vmax.f32 %v1229_v37, 0.0  ;;  %v1279_v61 = vmax.f32 %v1247_v38, 0.0  ;;  %v940_v4 = vadd.f32 %v2489_v51, %v707_v8  ;;  %v2567_v21 = vpop.f32.mrf.mxu1 }
 0x167   : > { %v1030_v2 = vmax.f32 %v941_v56, %v942_v58  ;;  %v1156_v3 = vmax.f32 %v977_v44, %v978_v59  ;;  %v976_v39 = vadd.f32 %v2489_v51, %v851_v9  ;;  %v2550_v53 = vrot.slane %v1396_v43, 5 }
 0x168   : > { %v2546_v1 = vpop.f32.mrf.mxu0  ;;  %v1260_v62 = vmax.f32 %v1228_v49, 0.0  ;;  %v2553_v63 = vadd.f32 %v2514_v45, %v1141_v54  ;;  %v1023_v52 = vmax.f32 %v939_v0, %v940_v4  ;;  %v2558_v12 = vsel %vm1410_vm0, %v1409_v47, %v1377_v60  ;;  %v2585_v44 = vpop.f32.mrf.mxu1 }
 0x169   : > { %v1031_v7 = vrot.slane %v1030_v2, 4  ;;  %v1157_v10 = vrot.slane %v1156_v3, 4  ;;  %v1149_v11 = vmax.f32 %v975_v57, %v976_v39  ;;  %v1395_v8 = vunpack.c.l.b16 %v2534_v48 }
 0x16a   : > { %v2555_v6 = vpop.f32.mrf.mxu0  ;;  %v2561_v13 = vpack.c.bf16 %v1261_v40, %v1261_v40  ;;  %v2563_v9 = vpack.c.bf16 %v1279_v61, %v1279_v61  ;;  %v1024_v17 = vrot.slane %v1023_v52, 4  ;;  %v2569_v22 = vpack.c.bf16 %v1260_v62, %v1260_v62  ;;  %v1892_v4 = vpop.f32.mrf.mxu1 }
 0x16b   : > { %v1032_v15 = vmax.f32 %v1030_v2, %v1031_v7  ;;  %v1158_v16 = vmax.f32 %v1156_v3, %v1157_v10  ;;  %v1150_v20 = vrot.slane %v1149_v11, 4  ;;  %v1278_v23 = vmax.f32 %v2553_v63, 0.0 }
 0x16c   : > { %v2565_v14 = vpop.f32.mrf.mxu0  ;;  %v945_v24 = vadd.f32 %v2522_v18, %v2487_v50  ;;  %v981_v25 = vadd.f32 %v2524_v19, %v2487_v50  ;;  %v1025_v31 = vmax.f32 %v1023_v52, %v1024_v17  ;;  %v943_v33 = vadd.f32 %v2487_v50, %v2526_v26 }
 0x16d   : > { %v1033_v28 = vrot.slane %v1032_v15, 2  ;;  %v1159_v29 = vrot.slane %v1158_v16, 2  ;;  %v1151_v32 = vmax.f32 %v1149_v11, %v1150_v20  ;;  %v979_v34 = vadd.f32 %v2487_v50, %v864_v30 }
 0x16e   : > { %v2576_v27 = vpop.f32.mrf.mxu0  ;;  %v946_v36 = vadd.f32 %v1852_v35, %v2489_v51  ;;  %v982_v37 = vadd.f32 %v1888_v46, %v2489_v51  ;;  %v1026_v19 = vrot.slane %v1025_v31, 2  ;;  %v944_v54 = vadd.f32 %v2489_v51, %v2530_v42 }
 0x16f   : > { %v1034_v18 = vmax.f32 %v1032_v15, %v1033_v28  ;;  %v1160_v41 = vmax.f32 %v1158_v16, %v1159_v29  ;;  %v1152_v43 = vrot.slane %v1151_v32, 2  ;;  %v980_v26 = vadd.f32 %v2489_v51, %v867_v5 }
 0x170   : > { %v2583_v38 = vpop.f32.mrf.mxu0  ;;  %v1044_v47 = vmax.f32 %v945_v24, %v946_v36  ;;  %v1170_v49 = vmax.f32 %v981_v25, %v982_v37  ;;  %v1027_v46 = vmax.f32 %v1025_v31, %v1026_v19  ;;  %v1037_v60 = vmax.f32 %v943_v33, %v944_v54  ;;  %v883_v31 = vpop.f32.mrf.mxu1 }
 0x171   : > { %v1035_v35 = vrot.slane %v1034_v18, 1  ;;  %v1161_v56 = vrot.slane %v1160_v41, 1  ;;  %v1153_v57 = vmax.f32 %v1151_v32, %v1152_v43  ;;  %v1163_v40 = vmax.f32 %v979_v34, %v980_v26 }
 0x172   : > { %v2590_v30 = vpop.f32.mrf.mxu0  ;;  %v1045_v58 = vrot.slane %v1044_v47, 4  ;;  %v1171_v59 = vrot.slane %v1170_v49, 4  ;;  %v1028_v2 = vrot.slane %v1027_v46, 1  ;;  %v1038_v42 = vrot.slane %v1037_v60, 4 }
 0x173   : > { %v1036_v61 = vmax.f32 %v1034_v18, %v1035_v35  ;;  %v1162_v0 = vmax.f32 %v1160_v41, %v1161_v56  ;;  %v1154_v3 = vrot.slane %v1153_v57, 1  ;;  %v1164_v63 = vrot.slane %v1163_v40, 4 }
 0x174   : > { %v1046_v39 = vmax.f32 %v1044_v47, %v1045_v58  ;;  %v1172_v62 = vmax.f32 %v1170_v49, %v1171_v59  ;;  %v2592_v5 = vpop.f32.mrf.mxu0  ;;  %v1029_v52 = vmax.f32 %v1027_v46, %v1028_v2  ;;  %v1039_v17 = vmax.f32 %v1037_v60, %v1038_v42 }
 0x175   : > { %v1231_v7 = vadd.f32 %v2514_v45, %v1036_v61  ;;  %v1249_v10 = vadd.f32 %v2514_v45, %v1162_v0  ;;  %v1155_v11 = vmax.f32 %v1153_v57, %v1154_v3  ;;  %v1165_v20 = vmax.f32 %v1163_v40, %v1164_v63  ;;  %v1895_v57 = vpop.f32.mrf.mxu1 }
 0x176   : > { %v1047_v15 = vrot.slane %v1046_v39, 2  ;;  %v1173_v16 = vrot.slane %v1172_v62, 2  ;;  %v1380_v24 = vunpack.c.l.b16 %v2561_v13  ;;  %v1230_v28 = vadd.f32 %v2514_v45, %v1029_v52  ;;  %v2599_v37 = vpop.f32.mrf.mxu0 }
 0x177   : > { %v1263_v25 = vmax.f32 %v1231_v7, 0.0  ;;  %v1248_v29 = vadd.f32 %v2514_v45, %v1155_v11  ;;  %v1040_v34 = vrot.slane %v1039_v17, 2  ;;  %v1166_v36 = vrot.slane %v1165_v20, 2 }
 0x178   : > { %v1048_v32 = vmax.f32 %v1046_v39, %v1047_v15  ;;  %v1174_v33 = vmax.f32 %v1172_v62, %v1173_v16  ;;  %v1379_v18 = vunpack.c.l.b16 %v2569_v22  ;;  %v2602_v41 = vpack.c.bf16 %v1278_v23, %v1278_v23  ;;  %v2611_v60 = vpop.f32.mrf.mxu0 }
 0x179   : > { %v1295_v19 = vpack.c.bf16 %v1263_v25, %v1263_v25  ;;  %v1281_v43 = vmax.f32 %v1249_v10, 0.0  ;;  %v1262_v47 = vmax.f32 %v1230_v28, 0.0  ;;  %v1041_v49 = vmax.f32 %v1039_v17, %v1040_v34  ;;  %v896_v10 = vpop.f32.mrf.mxu1 }
 0x17a   : > { %v1175_v13 = vrot.slane %v1174_v33, 1  ;;  %v1167_v54 = vmax.f32 %v1165_v20, %v1166_v36  ;;  %v2606_v26 = vrot.slane %v1395_v8, 6  ;;  %v1398_v35 = vunpack.c.l.b16 %v2563_v9  ;;  %v2633_v17 = vpop.f32.mrf.mxu0 }
 0x17b   : > { %v1280_v56 = vmax.f32 %v1248_v29, 0.0  ;;  %v1049_v46 = vrot.slane %v1048_v32, 1  ;;  %v2609_v58 = vrot.slane %v1380_v24, 5  ;;  %v1042_v23 = vrot.slane %v1041_v49, 1 }
 0x17c   : > { %v1176_v22 = vmax.f32 %v1174_v33, %v1175_v13  ;;  %v1168_v59 = vrot.slane %v1167_v54, 1  ;;  %v2613_v40 = vrot.slane %v1379_v18, 6  ;;  %v1397_v61 = vunpack.c.l.b16 %v2602_v41  ;;  %v1896_v18 = vpop.f32.mrf.mxu1 }
 0x17d   : > { %v1382_v0 = vunpack.c.l.b16 %v1295_v19  ;;  %v2616_v48 = vpack.c.bf16 %v1281_v43, %v1281_v43  ;;  %v2618_v8 = vpack.c.bf16 %v1262_v47, %v1262_v47  ;;  %v1043_v3 = vmax.f32 %v1041_v49, %v1042_v23  ;;  %v2648_v43 = vpop.f32.mrf.mxu0 }
 0x17e   : > { %v1251_v2 = vadd.f32 %v2514_v45, %v1176_v22  ;;  %v1169_v39 = vmax.f32 %v1167_v54, %v1168_v59  ;;  %v2621_v62 = vpack.c.bf16 %v1280_v56, %v1280_v56  ;;  %v2623_v42 = vmax.f32 %v1048_v32, %v1049_v46 }
 0x17f   : > { %v949_v63 = vadd.f32 %v2537_v55, %v2487_v50  ;;  %v985_v7 = vadd.f32 %v2567_v21, %v2487_v50  ;;  %v1232_v11 = vadd.f32 %v2514_v45, %v1043_v3  ;;  %v947_v16 = vadd.f32 %v2487_v50, %v2546_v1 }
 0x180   : > { %v1283_v52 = vmax.f32 %v1251_v2, 0.0  ;;  %v1250_v15 = vadd.f32 %v2514_v45, %v1169_v39  ;;  %v983_v20 = vadd.f32 %v2487_v50, %v2585_v44  ;;  %v950_v55 = vadd.f32 %v2555_v6, %v2489_v51  ;;  %v899_v2 = vpop.f32.mrf.mxu1 }
 0x181   : > { %v986_v24 = vadd.f32 %v1892_v4, %v2489_v51  ;;  %v948_v21 = vadd.f32 %v2489_v51, %v2565_v14  ;;  %v1264_v28 = vmax.f32 %v1232_v11, 0.0  ;;  %v984_v32 = vadd.f32 %v2489_v51, %v883_v31 }
 0x182   : > { %v1315_v25 = vpack.c.bf16 %v1283_v52, %v1283_v52  ;;  %v1282_v29 = vmax.f32 %v1250_v15, 0.0  ;;  %v2643_v33 = vrot.slane %v1382_v0, 3  ;;  %v1058_v1 = vmax.f32 %v949_v63, %v950_v55 }
 0x183   : > { %v1184_v34 = vmax.f32 %v985_v7, %v986_v24  ;;  %v1051_v36 = vmax.f32 %v947_v16, %v948_v21  ;;  %v1381_v44 = vunpack.c.l.b16 %v2618_v8  ;;  %v1177_v4 = vmax.f32 %v983_v20, %v984_v32  ;;  %v2663_v7 = vpop.f32.mrf.mxu0 }
 0x184   : > { %v1402_v19 = vunpack.c.l.b16 %v1315_v25  ;;  %v2646_v6 = vpack.c.bf16 %v1282_v29, %v1282_v29  ;;  %v1059_v14 = vrot.slane %v1058_v1, 4  ;;  %v953_v31 = vadd.f32 %v2576_v27, %v2487_v50 }
 0x185   : > { %v1185_v47 = vrot.slane %v1184_v34, 4  ;;  %v1052_v13 = vrot.slane %v1051_v36, 4  ;;  %v2654_v54 = vpack.c.bf16 %v1264_v28, %v1264_v28  ;;  %v1178_v56 = vrot.slane %v1177_v4, 4 }
 0x186   : > { %v2652_v49 = vrot.slane %v1402_v19, 7  ;;  %v989_v46 = vadd.f32 %v1895_v57, %v2487_v50  ;;  %v1401_v22 = vunpack.c.l.b16 %v2646_v6  ;;  %v1060_v23 = vmax.f32 %v1058_v1, %v1059_v14  ;;  %v2669_v1 = vpop.f32.mrf.mxu0 }
 0x187   : > { %v1186_v59 = vmax.f32 %v1184_v34, %v1185_v47  ;;  %v1053_v0 = vmax.f32 %v1051_v36, %v1052_v13  ;;  %v1179_v3 = vmax.f32 %v1177_v4, %v1178_v56  ;;  %v951_v39 = vadd.f32 %v2487_v50, %v2583_v38 }
 0x188   : > { %v987_v63 = vadd.f32 %v2487_v50, %v896_v10  ;;  %v954_v27 = vadd.f32 %v2590_v30, %v2489_v51  ;;  %v1061_v52 = vrot.slane %v1060_v23, 2  ;;  %v990_v15 = vadd.f32 %v1896_v18, %v2489_v51 }
 0x189   : > { %v1187_v11 = vrot.slane %v1186_v59, 2  ;;  %v1054_v57 = vrot.slane %v1053_v0, 2  ;;  %v1180_v16 = vrot.slane %v1179_v3, 2  ;;  %v952_v55 = vadd.f32 %v2489_v51, %v2592_v5 }
 0x18a   : > { %v1072_v20 = vmax.f32 %v953_v31, %v954_v27  ;;  %v988_v24 = vadd.f32 %v2489_v51, %v899_v2  ;;  %v1062_v38 = vmax.f32 %v1060_v23, %v1061_v52  ;;  %v1198_v25 = vmax.f32 %v989_v46, %v990_v15 }
 0x18b   : > { %v1188_v21 = vmax.f32 %v1186_v59, %v1187_v11  ;;  %v1055_v10 = vmax.f32 %v1053_v0, %v1054_v57  ;;  %v1181_v28 = vmax.f32 %v1179_v3, %v1180_v16  ;;  %v1065_v29 = vmax.f32 %v951_v39, %v952_v55  ;;  %v1899_v3 = vpop.f32.mrf.mxu1  ;;  %v2671_v39 = vpop.f32.mrf.mxu0 }
 0x18c   : > { %v1073_v30 = vrot.slane %v1072_v20, 4  ;;  %v1191_v32 = vmax.f32 %v987_v63, %v988_v24  ;;  %v1063_v34 = vrot.slane %v1062_v38, 1  ;;  %v1199_v19 = vrot.slane %v1198_v25, 4 }
 0x18d   : > { %v1189_v36 = vrot.slane %v1188_v21, 1  ;;  %v1056_v18 = vrot.slane %v1055_v10, 1  ;;  %v1182_v4 = vrot.slane %v1181_v28, 1  ;;  %v1066_v47 = vrot.slane %v1065_v29, 4 }
 0x18e   : > { %v1074_v14 = vmax.f32 %v1072_v20, %v1073_v30  ;;  %v1192_v5 = vrot.slane %v1191_v32, 4  ;;  %v1064_v13 = vmax.f32 %v1062_v38, %v1063_v34  ;;  %v1200_v23 = vmax.f32 %v1198_v25, %v1199_v19 }
 0x18f   : > { %v1190_v31 = vmax.f32 %v1188_v21, %v1189_v36  ;;  %v1057_v56 = vmax.f32 %v1055_v10, %v1056_v18  ;;  %v1183_v59 = vmax.f32 %v1181_v28, %v1182_v4  ;;  %v1067_v0 = vmax.f32 %v1065_v29, %v1066_v47  ;;  %v912_v29 = vpop.f32.mrf.mxu1 }
 0x190   : > { %v1075_v46 = vrot.slane %v1074_v14, 2  ;;  %v1193_v2 = vmax.f32 %v1191_v32, %v1192_v5  ;;  %v1235_v63 = vadd.f32 %v2514_v45, %v1064_v13  ;;  %v1201_v11 = vrot.slane %v1200_v23, 2  ;;  %v2677_v32 = vpop.f32.mrf.mxu0 }
 0x191   : > { %v1253_v27 = vadd.f32 %v2514_v45, %v1190_v31  ;;  %v1234_v52 = vadd.f32 %v2514_v45, %v1057_v56  ;;  %v1252_v57 = vadd.f32 %v2514_v45, %v1183_v59  ;;  %v1068_v16 = vrot.slane %v1067_v0, 2 }
 0x192   : > { %v1076_v15 = vmax.f32 %v1074_v14, %v1075_v46  ;;  %v1194_v20 = vrot.slane %v1193_v2, 2  ;;  %v1267_v55 = vmax.f32 %v1235_v63, 0.0  ;;  %v1202_v21 = vmax.f32 %v1200_v23, %v1201_v11  ;;  %v1900_v63 = vpop.f32.mrf.mxu1 }
 0x193   : > { %v1285_v24 = vmax.f32 %v1253_v27, 0.0  ;;  %v1266_v38 = vmax.f32 %v1234_v52, 0.0  ;;  %v1284_v10 = vmax.f32 %v1252_v57, 0.0  ;;  %v1069_v28 = vmax.f32 %v1067_v0, %v1068_v16  ;;  %v1871_v27 = vpop.f32.mrf.mxu0 }
 0x194   : > { %v1077_v25 = vrot.slane %v1076_v15, 1  ;;  %v1195_v30 = vmax.f32 %v1193_v2, %v1194_v20  ;;  %v1299_v34 = vpack.c.bf16 %v1267_v55, %v1267_v55  ;;  %v1203_v19 = vrot.slane %v1202_v21, 1 }
 0x195   : > { %v1317_v36 = vpack.c.bf16 %v1285_v24, %v1285_v24  ;;  %v1298_v18 = vpack.c.bf16 %v1266_v38, %v1266_v38  ;;  %v1316_v4 = vpack.c.bf16 %v1284_v10, %v1284_v10  ;;  %v1070_v14 = vrot.slane %v1069_v28, 1  ;;  %v915_v10 = vpop.f32.mrf.mxu1 }
 0x196   : > { %v1078_v47 = vmax.f32 %v1076_v15, %v1077_v25  ;;  %v1196_v5 = vrot.slane %v1195_v30, 1  ;;  %v2681_v13 = vrot.slane %v1381_v44, 4  ;;  %v2685_v31 = vadd.f32 %v2514_v45, %v2623_v42  ;;  %v800_v25 = vpop.f32.mrf.mxu0 }
 0x197   : > { %v1386_v56 = vunpack.c.l.b16 %v1299_v34  ;;  %v1204_v23 = vmax.f32 %v1202_v21, %v1203_v19  ;;  %v1403_v59 = vunpack.c.l.b16 %v1316_v4  ;;  %v1071_v0 = vmax.f32 %v1069_v28, %v1070_v14 }
 0x198   : > { %v1237_v46 = vadd.f32 %v2514_v45, %v1078_v47  ;;  %v1197_v2 = vmax.f32 %v1195_v30, %v1196_v5  ;;  %v1383_v52 = vunpack.c.l.b16 %v2654_v54  ;;  %v1459_v8 = vsel %vm1410_vm0, %v2652_v49, %v1401_v22 }
 0x199   : > { %v1404_v44 = vunpack.c.l.b16 %v1317_v36  ;;  %v1255_v42 = vadd.f32 %v2514_v45, %v1204_v23  ;;  %v1385_v11 = vunpack.c.l.b16 %v1298_v18  ;;  %v1236_v15 = vadd.f32 %v2514_v45, %v1071_v0 }
 0x19a   : > { %v1269_v57 = vmax.f32 %v1237_v46, 0.0  ;;  %v1254_v16 = vadd.f32 %v2514_v45, %v1197_v2  ;;  %v1430_v20 = vrot.slane %v1386_v56, 7  ;;  %v957_v24 = vadd.f32 %v2599_v37, %v2487_v50 }
 0x19b   : > { %v1287_v55 = vmax.f32 %v1255_v42, 0.0  ;;  %v993_v38 = vadd.f32 %v1899_v3, %v2487_v50  ;;  %v1460_v6 = vrot.slane %v1403_v59, 6  ;;  %v1268_v49 = vmax.f32 %v1236_v15, 0.0  ;;  %v1872_v59 = vpop.f32.mrf.mxu0 }
 0x19c   : > { %v2699_v21 = vpack.c.bf16 %v1269_v57, %v1269_v57  ;;  %v1286_v22 = vmax.f32 %v1254_v16, 0.0  ;;  %v991_v30 = vadd.f32 %v2487_v50, %v912_v29  ;;  %v958_v34 = vadd.f32 %v2633_v17, %v2489_v51 }
 0x19d   : > { %v2701_v28 = vpack.c.bf16 %v1287_v55, %v1287_v55  ;;  %v994_v36 = vadd.f32 %v1900_v63, %v2489_v51  ;;  %v2707_v18 = vpack.c.bf16 %v1268_v49, %v1268_v49  ;;  %v955_v3 = vadd.f32 %v2487_v50, %v2611_v60 }
 0x19e   : > { %v2709_v37 = vpack.c.bf16 %v1286_v22, %v1286_v22  ;;  %v956_v19 = vadd.f32 %v2489_v51, %v2648_v43  ;;  %v2715_v4 = vrot.slane %v1404_v44, 5  ;;  %v1086_v47 = vmax.f32 %v957_v24, %v958_v34 }
 0x19f   : > { %v1212_v14 = vmax.f32 %v993_v38, %v994_v36  ;;  %v992_v29 = vadd.f32 %v2489_v51, %v915_v10  ;;  %v2719_v17 = vsel %vm1410_vm0, %v1430_v20, %v1385_v11  ;;  %v2722_v5 = vsel %vm1413_vm1, %v1460_v6, %v1459_v8  ;;  %v803_v38 = vpop.f32.mrf.mxu0 }
 0x1a0   : > { %v1388_v56 = vunpack.c.l.b16 %v2699_v21  ;;  %v1079_v23 = vmax.f32 %v955_v3, %v956_v19  ;;  %v1406_v60 = vunpack.c.l.b16 %v2701_v28  ;;  %v1087_v46 = vrot.slane %v1086_v47, 4 }
 0x1a1   : > { %v1213_v43 = vrot.slane %v1212_v14, 4  ;;  %v1205_v0 = vmax.f32 %v991_v30, %v992_v29  ;;  %v1387_v2 = vunpack.c.l.b16 %v2707_v18  ;;  %v1405_v63 = vunpack.c.l.b16 %v2709_v37 }
 0x1a2   : > { %v1080_v44 = vrot.slane %v1079_v23, 4  ;;  %v961_v42 = vadd.f32 %v2663_v7, %v2487_v50  ;;  %v1088_v11 = vmax.f32 %v1086_v47, %v1087_v46  ;;  %v959_v15 = vadd.f32 %v2487_v50, %v2669_v1 }
 0x1a3   : > { %v1214_v8 = vmax.f32 %v1212_v14, %v1213_v43  ;;  %v1206_v57 = vrot.slane %v1205_v0, 4  ;;  %v962_v20 = vadd.f32 %v2671_v39, %v2489_v51  ;;  %v960_v55 = vadd.f32 %v2489_v51, %v2677_v32 }
 0x1a4   : > { %v1081_v16 = vmax.f32 %v1079_v23, %v1080_v44  ;;  %v965_v24 = vadd.f32 %v1871_v27, %v2487_v50  ;;  %v1089_v6 = vrot.slane %v1088_v11, 2  ;;  %v963_v7 = vadd.f32 %v2487_v50, %v800_v25 }
 0x1a5   : > { %v1215_v49 = vrot.slane %v1214_v8, 2  ;;  %v1207_v22 = vmax.f32 %v1205_v0, %v1206_v57  ;;  %v1100_v30 = vmax.f32 %v961_v42, %v962_v20  ;;  %v1093_v34 = vmax.f32 %v959_v15, %v960_v55 }
 0x1a6   : > { %v1082_v10 = vrot.slane %v1081_v16, 2  ;;  %v966_v1 = vadd.f32 %v1872_v59, %v2489_v51  ;;  %v1090_v36 = vmax.f32 %v1088_v11, %v1089_v6  ;;  %v964_v39 = vadd.f32 %v2489_v51, %v803_v38 }
 0x1a7   : > { %v1216_v3 = vmax.f32 %v1214_v8, %v1215_v49  ;;  %v1208_v19 = vrot.slane %v1207_v22, 2  ;;  %v1101_v32 = vrot.slane %v1100_v30, 4  ;;  %v1094_v14 = vrot.slane %v1093_v34, 4 }
 0x1a8   : > { %v1083_v47 = vmax.f32 %v1081_v16, %v1082_v10  ;;  %v1114_v27 = vmax.f32 %v965_v24, %v966_v1  ;;  %v1091_v29 = vrot.slane %v1090_v36, 1  ;;  %v1107_v43 = vmax.f32 %v963_v7, %v964_v39 }
 0x1a9   : > { %v1217_v23 = vrot.slane %v1216_v3, 1  ;;  %v1209_v46 = vmax.f32 %v1207_v22, %v1208_v19  ;;  %v1102_v50 = vmax.f32 %v1100_v30, %v1101_v32  ;;  %v1095_v25 = vmax.f32 %v1093_v34, %v1094_v14 }
 0x1aa   : > { %v1084_v0 = vrot.slane %v1083_v47, 1  ;;  %v1115_v44 = vrot.slane %v1114_v27, 4  ;;  %v1092_v42 = vmax.f32 %v1090_v36, %v1091_v29  ;;  %v1108_v11 = vrot.slane %v1107_v43, 4 }
 0x1ab   : > { %v1218_v57 = vmax.f32 %v1216_v3, %v1217_v23  ;;  %v1210_v59 = vrot.slane %v1209_v46, 1  ;;  %v1103_v15 = vrot.slane %v1102_v50, 2  ;;  %v1096_v20 = vrot.slane %v1095_v25, 2 }
 0x1ac   : > { %v1085_v8 = vmax.f32 %v1083_v47, %v1084_v0  ;;  %v1116_v51 = vmax.f32 %v1114_v27, %v1115_v44  ;;  %v1239_v16 = vadd.f32 %v2514_v45, %v1092_v42  ;;  %v1109_v38 = vmax.f32 %v1107_v43, %v1108_v11 }
 0x1ad   : > { %v1257_v55 = vadd.f32 %v2514_v45, %v1218_v57  ;;  %v1211_v24 = vmax.f32 %v1209_v46, %v1210_v59  ;;  %v1104_v49 = vmax.f32 %v1102_v50, %v1103_v15  ;;  %v1097_v22 = vmax.f32 %v1095_v25, %v1096_v20 }
 0x1ae   : > { %v1238_v6 = vadd.f32 %v2514_v45, %v1085_v8  ;;  %v1117_v7 = vrot.slane %v1116_v51, 2  ;;  %v1271_v10 = vmax.f32 %v1239_v16, 0.0  ;;  %v1110_v1 = vrot.slane %v1109_v38, 2 }
 0x1af   : > { %v1289_v30 = vmax.f32 %v1257_v55, 0.0  ;;  %v1256_v34 = vadd.f32 %v2514_v45, %v1211_v24  ;;  %v1105_v3 = vrot.slane %v1104_v49, 1  ;;  %v1098_v19 = vrot.slane %v1097_v22, 1 }
 0x1b0   : > { %v1270_v36 = vmax.f32 %v1238_v6, 0.0  ;;  %v1118_v39 = vmax.f32 %v1116_v51, %v1117_v7  ;;  %v1303_v47 = vpack.c.bf16 %v1271_v10, %v1271_v10  ;;  %v1111_v27 = vmax.f32 %v1109_v38, %v1110_v1 }
 0x1b1   : > { %v2744_v32 = vpack.c.bf16 %v1289_v30, %v1289_v30  ;;  %v1288_v14 = vmax.f32 %v1256_v34, 0.0  ;;  %v1106_v23 = vmax.f32 %v1104_v49, %v1105_v3  ;;  %v1099_v46 = vmax.f32 %v1097_v22, %v1098_v19 }
 0x1b2   : > { %v1302_v29 = vpack.c.bf16 %v1270_v36, %v1270_v36  ;;  %v1119_v43 = vrot.slane %v1118_v39, 1  ;;  %v1434_v0 = vrot.slane %v1388_v56, 5  ;;  %v2750_v50 = vrot.slane %v1406_v60, 3 }
 0x1b3   : > { %v1432_v25 = vrot.slane %v1387_v2, 6  ;;  %v1112_v44 = vrot.slane %v1111_v27, 1  ;;  %v1241_v57 = vadd.f32 %v2514_v45, %v1106_v23  ;;  %v1240_v59 = vadd.f32 %v2514_v45, %v1099_v46 }
 0x1b4   : > { %v1389_v42 = vunpack.c.l.b16 %v1302_v29  ;;  %v1120_v11 = vmax.f32 %v1118_v39, %v1119_v43  ;;  %v1464_v8 = vrot.slane %v1405_v63, 4  ;;  %v1390_v15 = vunpack.c.l.b16 %v1303_v47 }
 0x1b5   : > { %v1408_v21 = vunpack.c.l.b16 %v2744_v32  ;;  %v1113_v56 = vmax.f32 %v1111_v27, %v1112_v44  ;;  %v1320_v28 = vpack.c.bf16 %v1288_v14, %v1288_v14  ;;  %v1272_v60 = vmax.f32 %v1240_v59, 0.0 }
 0x1b6   : > { %v1243_v18 = vadd.f32 %v2514_v45, %v1120_v11  ;;  %v1265_v2 = vmax.f32 %v2685_v31, 0.0  ;;  %v1436_v20 = vrot.slane %v1389_v42, 4  ;;  %v1273_v16 = vmax.f32 %v1241_v57, 0.0 }
 0x1b7   : > { %v1242_v51 = vadd.f32 %v2514_v45, %v1113_v56  ;;  %v1414_v37 = vsel %vm1413_vm1, %v2613_v40, %v2558_v12  ;;  %v1304_v63 = vpack.c.bf16 %v1272_v60, %v1272_v60  ;;  %v1424_v31 = vrot.slane %v1383_v52, 2 }
 0x1b8   : > { %v1275_v55 = vmax.f32 %v1243_v18, 0.0  ;;  %v1297_v24 = vpack.c.bf16 %v1265_v2, %v1265_v2  ;;  %v1417_v38 = vsel %vm1416_vm2, %v2609_v58, %v1414_v37  ;;  %v1305_v49 = vpack.c.bf16 %v1273_v16, %v1273_v16 }
 0x1b9   : > { %v1274_v6 = vmax.f32 %v1242_v51, 0.0  ;;  %v1420_v22 = vsel %vm1419_vm3, %v2681_v13, %v1417_v38  ;;  %v1438_v45 = vrot.slane %v1390_v15, 3  ;;  %v1391_v7 = vunpack.c.l.b16 %v1304_v63 }
 0x1ba   : > { %v1307_v10 = vpack.c.bf16 %v1275_v55, %v1275_v55  ;;  %v1384_v30 = vunpack.c.l.b16 %v1297_v24  ;;  %v1407_v34 = vunpack.c.l.b16 %v1320_v28  ;;  %v1392_v40 = vunpack.c.l.b16 %v1305_v49 }
 0x1bb   : > { %v1306_v12 = vpack.c.bf16 %v1274_v6, %v1274_v6  ;;  %v1433_v1 = vsel %vm1413_vm1, %v1432_v25, %v2719_v17  ;;  %v1423_v58 = vsel %vm1422_vm4, %v2643_v33, %v1420_v22  ;;  %v1440_v13 = vrot.slane %v1391_v7, 2 }
 0x1bc   : > { %v1394_v36 = vunpack.c.l.b16 %v1307_v10  ;;  %v1435_v3 = vsel %vm1416_vm2, %v1434_v0, %v1433_v1  ;;  %v1426_v54 = vsel %vm1425_vm5, %v1424_v31, %v1423_v58  ;;  %v1427_v52 = vrot.slane %v1384_v30, 1 }
 0x1bd   : > { %v1393_v19 = vunpack.c.l.b16 %v1306_v12  ;;  %v1437_v39 = vsel %vm1419_vm3, %v1436_v20, %v1435_v3  ;;  %v1442_v14 = vrot.slane %v1392_v40, 1  ;;  %v1463_v17 = vsel %vm1416_vm2, %v2715_v4, %v2722_v5 }
 0x1be   : > { %v1444_v47 = vrot.slane %v1394_v36, 7  ;;  %v1439_v32 = vsel %vm1422_vm4, %v1438_v45, %v1437_v39  ;;  %v1399_v27 = vunpack.c.l.b16 %v2621_v62  ;;  %v1468_v33 = vrot.slane %v1407_v34, 2 }
 0x1bf   : > { %v1441_v29 = vsel %vm1425_vm5, %v1440_v13, %v1439_v32  ;;  %v1465_v23 = vsel %vm1419_vm3, %v1464_v8, %v1463_v17  ;;  %v1400_v46 = vunpack.c.l.b16 %v2616_v48  ;;  %v1429_v0 = vsel %vm1428_vm6, %v1427_v52, %v1426_v54 }
 0x1c0   : > { %v1445_v43 = vsel %vm1410_vm0, %v1444_v47, %v1393_v19  ;;  %v1443_v25 = vsel %vm1428_vm6, %v1442_v14, %v1441_v29  ;;  %v1450_v44 = vrot.slane %v1397_v61, 4  ;;  %v1452_v5 = vrot.slane %v1398_v35, 3 }
 0x1c1   : > { %v1447_v4 = vsel %vm1413_vm1, %v2606_v26, %v1445_v43  ;;  %v1472_v62 = vpack.c.b16 %v1443_v25, %v1429_v0  ;;  %v1470_v42 = vrot.slane %v1408_v21, 1  ;;  %v1467_v57 = vsel %vm1422_vm4, %v2750_v50, %v1465_v23  ;;  %v1750_v50 = vld [vmem:[%s2863_s5] ss:$0 sm:$0xff] }
 0x1c2   : > { %v1449_v48 = vsel %vm1416_vm2, %v2550_v53, %v1447_v4  ;;  %v1454_v59 = vrot.slane %v1399_v27, 2  ;;  %v1469_v61 = vsel %vm1425_vm5, %v1468_v33, %v1467_v57  ;;  %v1456_v11 = vrot.slane %v1400_v46, 1 }
 0x1c3   : > { %1917 = vmatprep.mubr.bf16.mxu1 %v1472_v62  ;;  %v1451_v41 = vsel %vm1419_vm3, %v1450_v44, %v1449_v48  ;;  %v1471_v8 = vsel %vm1428_vm6, %v1470_v42, %v1469_v61 }
 0x1c4   : > { %v1453_v26 = vsel %vm1422_vm4, %v1452_v5, %v1451_v41 }
 0x1c5   : > { %v1455_v9 = vsel %vm1425_vm5, %v1454_v59, %v1453_v26 }
 0x1c6   : > { %v1457_v35 = vsel %vm1428_vm6, %v1456_v11, %v1455_v9 }
 0x1c7   : > { %v1473_v53 = vpack.c.b16 %v1471_v8, %v1457_v35 }
 0x1c9   : > { %1918 = vmatmul.mubr.bf16.vlgmr.msra.gmra.mxu1 %v1473_v53 }
 0x289   : > { %v1919_v15 = vpop.f32.mrf.mxu1 }
 0x28a   : > { %v1567_v21 = vadd.f32 %v1919_v15, %v1750_v50 }
 0x28b   : > { %v1558_v56 = vpop.f32.mrf.mxu1 }
 0x28c   : > { %1575 = vst [vmem:[%s314_s8 + $0x10] sm:$0xff] %v1567_v21  ;;  %v1559_v28 = vadd.f32 %v1750_v50, %v1558_v56 }
 0x28d   : > { %v1920_v60 = vpop.f32.mrf.mxu1 }
 0x28e   : > { %1573 = vst [vmem:[%s314_s8] sm:$0xff] %v1559_v28  ;;  %v1570_v18 = vadd.f32 %v1920_v60, %v1750_v50 }
 0x28f   : > { %v1561_v2 = vpop.f32.mrf.mxu1 }
 0x290   : > { %1576 = vst [vmem:[%s314_s8 + $0x18] sm:$0xff] %v1570_v18  ;;  %v1562_v20 = vadd.f32 %v1750_v50, %v1561_v2 }
 0x292   : > { %1574 = vst [vmem:[%s314_s8 + $0x8] sm:$0xff] %v1562_v20 }
 0x293   : > { %2185 = shalt.err (!%p2182_p10)
}
 0x294   : > { %s2186_s29 = scalar_lea.hbm %s2815_s18, 512  ;;  %s2190_s7 = scalar_lea.hbm %s2864_s6, 1024 }
 0x295   : > { %p2187_p6 = scmp.ne.s32.totalorder %s2815_s18, %s2186_s29  ;;  %p2191_p3 = scmp.lt.s32.totalorder %s2815_s18, %s2864_s6 }
 0x296   : > { %p2192_p11 = scmp.lt.s32.totalorder %s2190_s7, %s2186_s29 }
 0x297   : > { %p2188_p4 = pnand %p2187_p6, %p2885_p1 }
 0x298   : > { %p2193_p5 = por %p2192_p11, %p2191_p3 }
 0x299   : > { %p2189_p8 = pneg %p2188_p4 }
 0x29b   : > { %p2194_p7 = pnand %p2193_p5, %p2189_p8 }
 0x29d   : > { %2197 = shalt.err (!%p2194_p7)
}
 0x29e   : > { %s2253_s17 = smov 128   ;;  %s2254_s10 = smov 8  }
 0x29f   : > { %1951 = dma.vmem_to_hbm [thread:$0]  (%p2885_p1), %s2810_s26, 512, %s2815_s18, %s1578_s15, %s2253_s17, %s2253_s17, %s2254_s10  }
 0x2a0 PF: > { %s1606_s12 = sand.u32 1, %s2232_s21   ;;  %p2886_p12 = scmp.ne.s32.totalorder %s2872_s28, 0 }
 0x2a1   : > { %p2887_p9 = scmp.ge.s32.totalorder %s2244_s24, 2  ;;  %s1607_s25 = scalar_lea.sflag [#allocation4], %s1606_s12 }
 0x2a3   : > { %p1968_p13 = pnand %p2887_p9, %p2886_p12 }
 0x2a5   : > { %p1969_p0 = pneg %p1968_p13 }
 0x2a7   : > { %2227 = dma.done.wait (%p1969_p0), %s1607_s25, 512  }
 0x2a8   : > { %2229 = vsyncadd (%p1969_p0), %s1607_s25, 4294966784  ;;  %p21_p2 = scmp.ge.s32.totalorder %s2379_s9, 4   ;;  %s2888_s21 = smov %s2236_s22 }
 0x2a9   : > { %s2889_s22 = smov %s2240_s23  ;;  %s2890_s23 = smov %s2389_s11 }
 0x2aa   : > { %s2891_s24 = smov %s2379_s9  ;;  %23 = sbr.rel (!%p21_p2) target bundleno = 7 (0x7), region = 101 }
 0x2af   :  { %1612 = vsyncpa [#allocation3], 1 }
 0x2b0   :  { %1614 = vsyncpa [#allocation3 + $0x1], 1 }
 0x2b1   :  { %1615 = vsyncpa [#allocation6], 1 }
 0x2b2   :  { %1616 = vsyncpa [#allocation9], 1 }
 0x2b3   :  { %1617 = vsyncpa [#allocation4], 1 }
 0x2b4   :  { %1619 = vsyncpa [#allocation4 + $0x1], 1 }

// kernel: tpu_custom_call.1
= control target key start
LH: loop header
LB: loop body
LE: loop exit
PB: predicated region body
PF: predicated region fallthrough
CT: control target
= control target key end

     0   :  { %11 = vsyncpa [#allocation3], 0  ;;  %s2858_s0 = inlined_call_operand.hbm [shape: bf16[64,16,128], index: 0, kind: input, shape index: {}]   ;;  %s2859_s1 = inlined_call_operand.hbm [shape: bf16[128,128], index: 1, kind: input, shape index: {}]   ;;  %s2860_s2 = inlined_call_operand.vmem [shape: f32[1,128], index: 2, kind: input, shape index: {}]   ;;  %s2861_s3 = inlined_call_operand.hbm [shape: bf16[16,128], index: 3, kind: input, shape index: {}]   ;;  %s2862_s4 = inlined_call_operand.hbm [shape: bf16[128,128], index: 4, kind: input, shape index: {}]   ;;  %s2863_s5 = inlined_call_operand.vmem [shape: f32[1,128], index: 5, kind: input, shape index: {}]   ;;  %s2864_s6 = inlined_call_operand.hbm [shape: f32[64,128], index: 6, kind: output, shape index: {}]  }
   0x1   :  { %13 = vsyncpa [#allocation3 + $0x1], 0 }
   0x2   :  { %14 = vsyncpa [#allocation6], 0 }
   0x3   :  { %15 = vsyncpa [#allocation9], 0 }
   0x4   :  { %16 = vsyncpa [#allocation4], 0 }
   0x5   :  { %18 = vsyncpa [#allocation4 + $0x1], 0  ;;  %s2290_s21 = smov 0   ;;  %s2292_s22 = smov 0  }
   0x6   :  { %s2294_s23 = smov 0   ;;  %s2296_s24 = smov 0  }
   0x7 LB: > { %s2311_s25 = sadd.s32 4294967295, %s2244_s24   ;;  %s1693_s26 = sadd.s32 4294967294, %s2244_s24   ;;  %s2244_s24 = sphi %s2296_s24, %s2891_s24   ;;  %s2240_s23 = sphi %s2294_s23, %s2890_s23   ;;  %s2236_s22 = sphi %s2292_s22, %s2889_s22   ;;  %s2232_s21 = sphi %s2290_s21, %s2888_s21  }
   0x8   : > { %p44_p0 = scmp.ne.s32.totalorder %s2236_s22, %s2232_s21  ;;  %p2865_p1 = scmp.eq.s32.totalorder %s2311_s25, 0 }
   0x9   : > { %p173_p2 = scmp.eq.s32.totalorder %s2311_s25, 1  ;;  %p179_p3 = scmp.eq.s32.totalorder %s1693_s26, 1 }
   0xa   : > { %p2320_p4 = por %p2865_p1, %p44_p0  ;;  %p1694_p5 = scmp.ge.s32.totalorder %s2244_s24, 1 }
   0xb   : > { %p2325_p6 = por %p179_p3, %p44_p0  ;;  %p186_p7 = scmp.lt.s32.totalorder %s2244_s24, 3 }
   0xc   : > { %s2871_s27 = scalar_select %p2320_p4, 1, 0 }
   0xd   : > { %s2872_s28 = scalar_select %p2325_p6, 1, 0 }
   0xe   : > { %p2330_p8 = pnand %p1694_p5, %p186_p7  ;;  %s2246_s30 = smov [#allocation5]  }
   0xf   : > { %s198_s7 = sshll.u32 %s2246_s30, 4  ;;  %s2247_s9 = smov [#allocation7]   ;;  %s199_s7 = int_to_ptr.vmem [resolvable:$true] %s198_s7 }
  0x10   : > { %s2873_s29 = scalar_select %p2330_p8, 1, 0 }
  0x11   : > { %p1953_p9 = pneg %p2330_p8  ;;  %s214_s10 = sshll.u32 %s2247_s9, 4  ;;  %s215_s10 = int_to_ptr.vmem [resolvable:$true] %s214_s10 }
  0x12   : > { %s2248_s11 = smov [#allocation8]   ;;  %s2077_s13 = scalar_lea.vmem %s199_s7, 1024 }
  0x13   : > { %p2339_p11 = pnand %p1953_p9, %p2865_p1  ;;  %s227_s12 = sshll.u32 %s2248_s11, 4  ;;  %s228_s12 = int_to_ptr.vmem [resolvable:$true] %s227_s12 }
  0x14   : > { %p2078_p13 = scmp.ne.s32.totalorder %s199_s7, %s2077_s13  ;;  %p2085_p5 = scmp.lt.s32.totalorder %s199_s7, %s199_s7 }
  0x15   : > { %p2068_p12 = pneg %p2339_p11  ;;  %p2086_p7 = scmp.lt.s32.totalorder %s2077_s13, %s2077_s13 }
  0x17   : > { %p2080_p0 = pnand %p2078_p13, %p2068_p12  ;;  %p2087_p9 = por %p2086_p7, %p2085_p5 }
  0x19   : > { %p2081_p3 = pneg %p2080_p0 }
  0x1b   : > { %p2088_p10 = pnand %p2087_p9, %p2081_p3 }
  0x1d   : > { %2091 = shalt.err (!%p2088_p10)
}
  0x1e   : > { %s2866_s14 = smov 64   ;;  %s2867_s15 = smov 4  }
  0x1f   : > { %1956 = dma.hbm_to_vmem [thread:$0]  (!%p2339_p11), %s2859_s1, 1024, %s199_s7, [#allocation6], %s2866_s14, %s2866_s14, %s2867_s15  }
  0x20   : > { %s2103_s18 = scalar_lea.vmem %s215_s10, 128  ;;  %p2111_p3 = scmp.lt.s32.totalorder %s215_s10, %s215_s10 }
  0x21   : > { %p2104_p13 = scmp.ne.s32.totalorder %s215_s10, %s2103_s18  ;;  %p2112_p10 = scmp.lt.s32.totalorder %s2103_s18, %s2103_s18 }
  0x23   : > { %p2106_p0 = pnand %p2104_p13, %p2068_p12  ;;  %p2113_p7 = por %p2112_p10, %p2111_p3 }
  0x25   : > { %p2107_p5 = pneg %p2106_p0 }
  0x27   : > { %p2114_p9 = pnand %p2113_p7, %p2107_p5 }
  0x29   : > { %2117 = shalt.err (!%p2114_p9)
}
  0x2a   : > { %1959 = dma.hbm_to_vmem [thread:$0]  (!%p2339_p11), %s2861_s3, 128, %s215_s10, [#allocation6], %s2866_s14, %s2866_s14, %s2867_s15  }
  0x2b   : > { %s2129_s26 = scalar_lea.vmem %s228_s12, 1024  ;;  %p2137_p3 = scmp.lt.s32.totalorder %s228_s12, %s228_s12 }
  0x2c   : > { %p2130_p1 = scmp.ne.s32.totalorder %s228_s12, %s2129_s26  ;;  %p2138_p5 = scmp.lt.s32.totalorder %s2129_s26, %s2129_s26 }
  0x2e   : > { %p2132_p13 = pnand %p2130_p1, %p2068_p12  ;;  %p2139_p10 = por %p2138_p5, %p2137_p3 }
  0x30   : > { %p2133_p0 = pneg %p2132_p13 }
  0x32   : > { %p2140_p7 = pnand %p2139_p10, %p2133_p0 }
  0x34   : > { %2143 = shalt.err (!%p2140_p7)
}
  0x35   : > { %1962 = dma.hbm_to_vmem [thread:$0]  (!%p2339_p11), %s2862_s4, 1024, %s228_s12, [#allocation9], %s2866_s14, %s2866_s14, %s2867_s15  }
  0x36   : > { %s2379_s9 = sadd.s32 1, %s2244_s24   ;;  %s31_s10 = sadd.s32 1, %s2240_s23 }
  0x37   : > { %s28_s8 = ssub.s32 %s2244_s24, %s2379_s9  ;;  %p38_p12 = scmp.ne.s32.totalorder %s2240_s23, %s2236_s22 }
  0x38   : > { %p29_p1 = scmp.eq.s32.totalorder %s28_s8, 0  ;;  %p39_p9 = scmp.eq.s32.totalorder %s2244_s24, 0 }
  0x39   : > { %p1974_p13 = scmp.lt.s32.totalorder %s2244_s24, 2  ;;  %p2393_p3 = por %p173_p2, %p38_p12 }
  0x3a   : > { %s2389_s11 = scalar_select %p29_p1, %s2240_s23, %s31_s10  }
  0x3b   : > { %p40_p0 = por %p39_p9, %p38_p12  ;;  %s244_s16 = sand.u32 1, %s2240_s23  }
  0x3c   : > { %s2875_s13 = scalar_select %p2393_p3, 1, 0 }
  0x3d   : > { %s1765_s17 = sshll.u32 %s2244_s24, 12  ;;  %s1699_s12 = sshll.u32 %s244_s16, 8 }
  0x3e   : > { %s2402_s20 = scalar_lea.hbm %s2858_s0, %s1765_s17  ;;  %s248_s26 = scalar_lea.vmem [#allocation2], %s1699_s12 }
  0x3f   : > { %s256_s30 = sshll.u32 %s248_s26, 4  ;;  %p2404_p11 = pnand %p1974_p13, %p40_p0  ;;  %s2408_s30 = int_to_ptr.vmem [resolvable:$true] %s256_s30 }
  0x40   : > { %s2410_s8 = scalar_lea.sflag [#allocation3], %s244_s16  ;;  %s2144_s10 = scalar_lea.hbm %s2402_s20, 4096 }
  0x41   : > { %p2145_p2 = scmp.ne.s32.totalorder %s2402_s20, %s2144_s10  ;;  %p2146_p5 = pneg %p2404_p11 }
  0x42   : > { %s2149_s12 = scalar_lea.hbm %s2858_s0, 8192  ;;  %p2150_p1 = scmp.lt.s32.totalorder %s2402_s20, %s2858_s0 }
  0x43   : > { %p2147_p10 = pnand %p2146_p5, %p2145_p2  ;;  %p2151_p12 = scmp.lt.s32.totalorder %s2149_s12, %s2144_s10 }
  0x45   : > { %p2148_p7 = pneg %p2147_p10  ;;  %p2152_p9 = por %p2151_p12, %p2150_p1 }
  0x47   : > { %p2153_p13 = pnand %p2152_p9, %p2148_p7 }
  0x49   : > { %2156 = shalt.err (!%p2153_p13)
}
  0x4a   : > { %s2157_s16 = scalar_lea.vmem %s2408_s30, 4096  ;;  %s2251_s14 = smov [#allocation2]  }
  0x4b   : > { %p2158_p0 = scmp.ne.s32.totalorder %s2408_s30, %s2157_s16  ;;  %s2162_s15 = sshll.u32 %s2251_s14, 4  ;;  %s2163_s15 = int_to_ptr.vmem [resolvable:$false] %s2162_s15 }
  0x4c   : > { %s2164_s17 = scalar_lea.vmem %s2163_s15, 8192  ;;  %p2165_p10 = scmp.lt.s32.totalorder %s2408_s30, %s2163_s15 }
  0x4d   : > { %p2160_p6 = pnand %p2158_p0, %p2146_p5  ;;  %p2166_p3 = scmp.lt.s32.totalorder %s2164_s17, %s2157_s16 }
  0x4f   : > { %p2161_p2 = pneg %p2160_p6  ;;  %p2167_p4 = por %p2166_p3, %p2165_p10 }
  0x51   : > { %p2168_p8 = pnand %p2167_p4, %p2161_p2 }
  0x53   : > { %2171 = shalt.err (!%p2168_p8)
}
  0x54   : > { %s2877_s10 = smov 4   ;;  %s2878_s18 = smov 64  }
  0x55   : > { %1966 = dma.hbm_to_vmem [thread:$0]  (!%p2404_p11), %s2402_s20, 4096, %s2408_s30, %s2410_s8, %s2878_s18, %s2878_s18, %s2877_s10  }
  0x56   : > { %p2879_p6 = scmp.ne.s32.totalorder %s2873_s29, 0 }
  0x57   : > { %s2437_s14 = sand.u32 (!%p2879_p6), 1, %s2236_s22   ;;  %p2880_p4 = scmp.ne.s32.totalorder (!%p2879_p6), %s2871_s27, 0 }
  0x58   : > { %268 = sbr.rel (%p2879_p6) target bundleno = 672 (0x2a0), region = 44  ;;  %s1704_s15 = sshll.u32 (!%p2879_p6), %s2437_s14, 8 }
  0x59   : > { %s271_s12 = scalar_lea.sflag (!%p2879_p6), [#allocation3], %s2437_s14  ;;  %s2441_s19 = scalar_lea.vmem (!%p2879_p6), [#allocation2], %s1704_s15 }
  0x5d   : > { %2215 = dma.done.wait (%p2880_p4), %s271_s12, 4096  }
  0x5e   : > { %2217 = vsyncadd (%p2880_p4), %s271_s12, 4294963200  ;;  %p2881_p8 = scmp.eq.s32.totalorder %s2311_s25, 0 }
  0x60   : > { %2219 = dma.done.wait (%p2881_p8), [#allocation6], 1152   ;;  %p2882_p3 = pmov %p2881_p8 }
  0x62   : > { %2221 = vsyncadd (%p2882_p3), [#allocation6], 4294966144  ;;  %p2883_p11 = pmov %p2882_p3 }
  0x63   : > { %p2884_p5 = pmov %p2882_p3 }
  0x64   : > { %2223 = dma.done.wait (%p2883_p11), [#allocation9], 1024  }
  0x65   : > { %2225 = vsyncadd (%p2884_p5), [#allocation9], 4294966272  ;;  %v2018_v0 = vld [vmem:[#allocation5 + $0x38] sm:$0xff]   ;;  %v2019_v1 = vld [vmem:[#allocation5 + $0x30] sm:$0xff]   ;;  %vm1410_vm0 = vcmask 1041409   ;;  %vm1413_vm1 = vcmask 1042434  }
  0x66   : > { %1821 = vmatprep.subr.bf16.mxu0 %v2018_v0  ;;  %1921 = vmatprep.subr.bf16.mxu1 %v2018_v0  ;;  %v2020_v2 = vld [vmem:[#allocation5 + $0x28] sm:$0xff]   ;;  %v2021_v3 = vld [vmem:[#allocation5 + $0x20] sm:$0xff]   ;;  %v2027_v5 = vld [vmem:[%s2441_s19 + $0x90] sm:$0xff]   ;;  %vm1416_vm2 = vcmask 1043459   ;;  %vm1419_vm3 = vcmask 1044484   ;;  %vm1422_vm4 = vcmask 1045509  }
  0x67   : > { %1822 = vmatpush3.bf16.msra.mxu0 %v2018_v0  ;;  %1929 = vmatpush3.bf16.msra.mxu1 %v2018_v0  ;;  %v2026_v4 = vld [vmem:[%s2441_s19] sm:$0xff]   ;;  %v2022_v6 = vld [vmem:[#allocation5 + $0x18] sm:$0xff]   ;;  %v2023_v7 = vld [vmem:[#allocation5 + $0x10] sm:$0xff]   ;;  %vm1425_vm5 = vcmask 1046534   ;;  %vm1428_vm6 = vcmask 1047559   ;;  %s1708_s20 = sshll.u32 %s2437_s14, 5 }
  0x68   : > { %1823 = vmatprep.subr.bf16.mxu0 %v2019_v1  ;;  %1922 = vmatprep.subr.bf16.mxu1 %v2019_v1  ;;  %v2024_v8 = vld [vmem:[#allocation5 + $0x8] sm:$0xff]   ;;  %v2025_v9 = vld [vmem:[#allocation5] sm:$0xff]   ;;  %v2029_v11 = vld [vmem:[%s2441_s19 + $0x98] sm:$0xff]   ;;  %s314_s8 = scalar_lea.vmem [#allocation10], %s1708_s20  ;;  %s1766_s16 = sshll.u32 %s2311_s25, 9 }
  0x69   : > { %1837 = vmatprep.mubr.bf16.mxu0 %v2026_v4  ;;  %1873 = vmatprep.mubr.bf16.mxu1 %v2027_v5  ;;  %v2028_v10 = vld [vmem:[%s2441_s19 + $0x8] sm:$0xff]   ;;  %v2030_v12 = vld [vmem:[%s2441_s19 + $0x10] sm:$0xff]   ;;  %v2031_v13 = vld [vmem:[%s2441_s19 + $0xa0] sm:$0xff]   ;;  %s1591_s26 = sshll.u32 %s314_s8, 4  ;;  %s2815_s18 = scalar_lea.hbm %s2864_s6, %s1766_s16  ;;  %s2810_s26 = int_to_ptr.vmem [resolvable:$true] %s1591_s26 }
  0x6a   : > { %v2032_v14 = vld [vmem:[%s2441_s19 + $0x18] sm:$0xff]   ;;  %v2033_v15 = vld [vmem:[%s2441_s19 + $0xa8] sm:$0xff]   ;;  %v2034_v16 = vld [vmem:[%s2441_s19 + $0x20] sm:$0xff]   ;;  %s1578_s15 = scalar_lea.sflag [#allocation4], %s2437_s14  ;;  %s2172_s12 = scalar_lea.vmem %s2810_s26, 512 }
  0x6b   : > { %1824 = vmatpush3.bf16.msra.mxu0 %v2019_v1  ;;  %1930 = vmatpush3.bf16.msra.mxu1 %v2019_v1  ;;  %v2035_v17 = vld [vmem:[%s2441_s19 + $0xb0] sm:$0xff]   ;;  %v2036_v18 = vld [vmem:[%s2441_s19 + $0x28] sm:$0xff]   ;;  %v2037_v19 = vld [vmem:[%s2441_s19 + $0xb8] sm:$0xff]   ;;  %p2173_p7 = scmp.ne.s32.totalorder %s2810_s26, %s2172_s12  ;;  %p2885_p1 = scmp.ne.s32.totalorder %s2875_s13, 0 }
  0x6c   : > { %1825 = vmatprep.subr.bf16.mxu0 %v2020_v2  ;;  %1923 = vmatprep.subr.bf16.mxu1 %v2020_v2  ;;  %v2038_v20 = vld [vmem:[%s2441_s19 + $0x30] sm:$0xff]   ;;  %v2039_v21 = vld [vmem:[%s2441_s19 + $0xc0] sm:$0xff]   ;;  %v2040_v22 = vld [vmem:[%s2441_s19 + $0x38] sm:$0xff]   ;;  %s2252_s25 = smov [#allocation10]  }
  0x6d   : > { %v2041_v23 = vld [vmem:[%s2441_s19 + $0xc8] sm:$0xff]   ;;  %v2042_v24 = vld [vmem:[%s2441_s19 + $0x40] sm:$0xff]   ;;  %v2043_v25 = vld [vmem:[%s2441_s19 + $0xd0] sm:$0xff]   ;;  %p2174_p12 = pnand %p2173_p7, %p2885_p1 }
  0x6e   : > { %v2044_v26 = vld [vmem:[%s2441_s19 + $0x48] sm:$0xff]   ;;  %v2045_v27 = vld [vmem:[%s2441_s19 + $0xd8] sm:$0xff]   ;;  %v2046_v28 = vld [vmem:[%s2441_s19 + $0x50] sm:$0xff]  }
  0x6f   : > { %1826 = vmatpush3.bf16.msra.mxu0 %v2020_v2  ;;  %1931 = vmatpush3.bf16.msra.mxu1 %v2020_v2  ;;  %v2047_v29 = vld [vmem:[%s2441_s19 + $0xe0] sm:$0xff]   ;;  %v2048_v30 = vld [vmem:[%s2441_s19 + $0x58] sm:$0xff]   ;;  %v2049_v31 = vld [vmem:[%s2441_s19 + $0xe8] sm:$0xff]   ;;  %p2175_p9 = pneg %p2174_p12 }
  0x70   : > { %1827 = vmatprep.subr.bf16.mxu0 %v2021_v3  ;;  %1924 = vmatprep.subr.bf16.mxu1 %v2021_v3  ;;  %v2050_v32 = vld [vmem:[%s2441_s19 + $0x60] sm:$0xff]   ;;  %v2051_v33 = vld [vmem:[%s2441_s19 + $0xf0] sm:$0xff]   ;;  %v2052_v34 = vld [vmem:[%s2441_s19 + $0x68] sm:$0xff]  }
  0x71   : > { %v2053_v35 = vld [vmem:[%s2441_s19 + $0xf8] sm:$0xff]   ;;  %v2054_v36 = vld [vmem:[%s2441_s19 + $0x70] sm:$0xff]   ;;  %v2056_v38 = vld [vmem:[%s2441_s19 + $0x80] sm:$0xff]  }
  0x72   : > { %v2055_v37 = vld [vmem:[%s2441_s19 + $0x78] sm:$0xff]   ;;  %v2057_v39 = vld [vmem:[%s2441_s19 + $0x88] sm:$0xff]   ;;  %v2058_v40 = vld [vmem:[#allocation8 + $0x38] sm:$0xff]   ;;  %s2176_s19 = sshll.u32 %s2252_s25, 4  ;;  %s2177_s19 = int_to_ptr.vmem [resolvable:$false] %s2176_s19 }
  0x73   : > { %1828 = vmatpush3.bf16.msra.mxu0 %v2021_v3  ;;  %1932 = vmatpush3.bf16.msra.mxu1 %v2021_v3  ;;  %v2059_v41 = vld [vmem:[#allocation8 + $0x30] sm:$0xff]   ;;  %v2060_v42 = vld [vmem:[#allocation8 + $0x28] sm:$0xff]   ;;  %v2061_v43 = vld [vmem:[#allocation8 + $0x20] sm:$0xff]   ;;  %s2178_s27 = scalar_lea.vmem %s2177_s19, 1024  ;;  %p2179_p13 = scmp.lt.s32.totalorder %s2810_s26, %s2177_s19 }
  0x74   : > { %1829 = vmatprep.subr.bf16.mxu0 %v2022_v6  ;;  %1925 = vmatprep.subr.bf16.mxu1 %v2022_v6  ;;  %v2062_v44 = vld [vmem:[#allocation8 + $0x18] sm:$0xff]   ;;  %v2063_v45 = vld [vmem:[#allocation8 + $0x10] sm:$0xff]   ;;  %v2064_v47 = vld [vmem:[#allocation8 + $0x8] sm:$0xff]   ;;  %p2180_p0 = scmp.lt.s32.totalorder %s2178_s27, %s2172_s12 }
  0x75   : > { %v1768_v46 = vld [vmem:[#allocation7] sm:$0xff]   ;;  %v2065_v55 = vld [vmem:[#allocation8] sm:$0xff]  }
  0x76   : > { %v2487_v50 = vunpack.c.l.bf16 %v1768_v46  ;;  %v2489_v51 = vunpack.c.h.bf16 %v1768_v46  ;;  %p2181_p2 = por %p2180_p0, %p2179_p13 }
  0x77   : > { %1830 = vmatpush3.bf16.msra.mxu0 %v2022_v6  ;;  %1933 = vmatpush3.bf16.msra.mxu1 %v2022_v6 }
  0x78   : > { %1831 = vmatprep.subr.bf16.mxu0 %v2023_v7  ;;  %1926 = vmatprep.subr.bf16.mxu1 %v2023_v7  ;;  %p2182_p10 = pnand %p2181_p2, %p2175_p9 }
  0x7b   : > { %1832 = vmatpush3.bf16.msra.mxu0 %v2023_v7  ;;  %1934 = vmatpush3.bf16.msra.mxu1 %v2023_v7 }
  0x7c   : > { %1833 = vmatprep.subr.bf16.mxu0 %v2024_v8  ;;  %1927 = vmatprep.subr.bf16.mxu1 %v2024_v8 }
  0x7f   : > { %1834 = vmatpush3.bf16.msra.mxu0 %v2024_v8  ;;  %1935 = vmatpush3.bf16.msra.mxu1 %v2024_v8 }
  0x80   : > { %1835 = vmatprep.subr.bf16.mxu0 %v2025_v9  ;;  %1928 = vmatprep.subr.bf16.mxu1 %v2025_v9 }
  0x83   : > { %1836 = vmatpush3.bf16.msra.mxu0 %v2025_v9  ;;  %1936 = vmatpush3.bf16.msra.mxu1 %v2025_v9 }
  0x84   : > { %1901 = vmatprep.subr.bf16.mxu1 %v2058_v40 }
  0x86   : > { %1838 = vmatmul.mubr.bf16.vlgmr.msra.gmra.mxu0 %v2028_v10  ;;  %1874 = vmatmul.mubr.bf16.vlgmr.msra.gmra.mxu1 %v2029_v11 }
  0x87   : > { %1841 = vmatprep.mubr.bf16.mxu0 %v2030_v12  ;;  %1877 = vmatprep.mubr.bf16.mxu1 %v2031_v13 }
  0x88   : > { %1902 = vmatpush3.bf16.msra.mxu1 %v2058_v40 }
  0x89   : > { %1903 = vmatprep.subr.bf16.mxu1 %v2059_v41 }
  0x8c   : > { %1904 = vmatpush3.bf16.msra.mxu1 %v2059_v41 }
  0x8d   : > { %1905 = vmatprep.subr.bf16.mxu1 %v2060_v42 }
  0x8e   : > { %1842 = vmatmul.mubr.bf16.gmra.mxu0 %v2032_v14  ;;  %1878 = vmatmul.mubr.bf16.gmra.mxu1 %v2033_v15 }
  0x8f   : > { %1845 = vmatprep.mubr.bf16.mxu0 %v2034_v16  ;;  %1881 = vmatprep.mubr.bf16.mxu1 %v2035_v17 }
  0x90   : > { %1906 = vmatpush3.bf16.msra.mxu1 %v2060_v42 }
  0x91   : > { %1907 = vmatprep.subr.bf16.mxu1 %v2061_v43 }
  0x94   : > { %1908 = vmatpush3.bf16.msra.mxu1 %v2061_v43 }
  0x95   : > { %1909 = vmatprep.subr.bf16.mxu1 %v2062_v44 }
  0x96   : > { %1846 = vmatmul.mubr.bf16.gmra.mxu0 %v2036_v18  ;;  %1882 = vmatmul.mubr.bf16.gmra.mxu1 %v2037_v19 }
  0x97   : > { %1849 = vmatprep.mubr.bf16.mxu0 %v2038_v20  ;;  %1885 = vmatprep.mubr.bf16.mxu1 %v2039_v21 }
  0x98   : > { %1910 = vmatpush3.bf16.msra.mxu1 %v2062_v44 }
  0x99   : > { %1911 = vmatprep.subr.bf16.mxu1 %v2063_v45 }
  0x9c   : > { %1912 = vmatpush3.bf16.msra.mxu1 %v2063_v45  ;;  %v2514_v45 = vld [vmem:[%s2860_s2] ss:$0 sm:$0xff] }
  0x9d   : > { %1913 = vmatprep.subr.bf16.mxu1 %v2064_v47 }
  0x9e   : > { %1850 = vmatmul.mubr.bf16.gmra.mxu0 %v2040_v22  ;;  %1886 = vmatmul.mubr.bf16.gmra.mxu1 %v2041_v23 }
  0x9f   : > { %1853 = vmatprep.mubr.bf16.mxu0 %v2042_v24  ;;  %1889 = vmatprep.mubr.bf16.mxu1 %v2043_v25 }
  0xa0   : > { %1914 = vmatpush3.bf16.msra.mxu1 %v2064_v47 }
  0xa1   : > { %1915 = vmatprep.subr.bf16.mxu1 %v2065_v55 }
  0xa4   : > { %1916 = vmatpush3.bf16.msra.mxu1 %v2065_v55 }
  0xa6   : > { %1854 = vmatmul.mubr.bf16.gmra.mxu0 %v2044_v26  ;;  %1890 = vmatmul.mubr.bf16.gmra.mxu1 %v2045_v27 }
  0xa7   : > { %1857 = vmatprep.mubr.bf16.mxu0 %v2046_v28  ;;  %1893 = vmatprep.mubr.bf16.mxu1 %v2047_v29 }
  0xae   : > { %1858 = vmatmul.mubr.bf16.gmra.mxu0 %v2048_v30  ;;  %1894 = vmatmul.mubr.bf16.gmra.mxu1 %v2049_v31 }
  0xaf   : > { %1861 = vmatprep.mubr.bf16.mxu0 %v2050_v32  ;;  %1897 = vmatprep.mubr.bf16.mxu1 %v2051_v33 }
  0xb6   : > { %1862 = vmatmul.mubr.bf16.gmra.mxu0 %v2052_v34  ;;  %1898 = vmatmul.mubr.bf16.gmra.mxu1 %v2053_v35 }
  0xb7   : > { %1865 = vmatprep.mubr.bf16.mxu0 %v2054_v36 }
  0xbe   : > { %1866 = vmatmul.mubr.bf16.gmra.mxu0 %v2055_v37 }
  0xbf   : > { %1869 = vmatprep.mubr.bf16.mxu0 %v2056_v38 }
  0xc6   : > { %1870 = vmatmul.mubr.bf16.gmra.mxu0 %v2057_v39 }
 0x146   : > { %v1839_v48 = vpop.f32.mrf.mxu0  ;;  %v1875_v49 = vpop.f32.mrf.mxu1 }
 0x147   : > { %v969_v54 = vadd.f32 %v1875_v49, %v2487_v50  ;;  %v933_v58 = vadd.f32 %v1839_v48, %v2487_v50 }
 0x148   : > { %v672_v52 = vpop.f32.mrf.mxu0  ;;  %v816_v53 = vpop.f32.mrf.mxu1 }
 0x149   : > { %v967_v59 = vadd.f32 %v2487_v50, %v816_v53  ;;  %v931_v62 = vadd.f32 %v2487_v50, %v672_v52 }
 0x14a   : > { %v1840_v56 = vpop.f32.mrf.mxu0  ;;  %v1876_v57 = vpop.f32.mrf.mxu1 }
 0x14b   : > { %v934_v60 = vadd.f32 %v1840_v56, %v2489_v51  ;;  %v970_v61 = vadd.f32 %v1876_v57, %v2489_v51 }
 0x14c   : > { %v675_v63 = vpop.f32.mrf.mxu0  ;;  %v819_v0 = vpop.f32.mrf.mxu1 }
 0x14d   : > { %v1002_v1 = vmax.f32 %v933_v58, %v934_v60  ;;  %v1128_v2 = vmax.f32 %v969_v54, %v970_v61  ;;  %v932_v3 = vadd.f32 %v2489_v51, %v675_v63  ;;  %v968_v4 = vadd.f32 %v2489_v51, %v819_v0 }
 0x14e   : > { %v1843_v5 = vpop.f32.mrf.mxu0  ;;  %v1879_v6 = vpop.f32.mrf.mxu1 }
 0x14f   : > { %v1003_v7 = vrot.slane %v1002_v1, 4  ;;  %v1129_v8 = vrot.slane %v1128_v2, 4  ;;  %v995_v9 = vmax.f32 %v931_v62, %v932_v3  ;;  %v1121_v10 = vmax.f32 %v967_v59, %v968_v4 }
 0x150   : > { %v688_v11 = vpop.f32.mrf.mxu0  ;;  %v832_v12 = vpop.f32.mrf.mxu1  ;;  %v937_v17 = vadd.f32 %v1843_v5, %v2487_v50  ;;  %v973_v18 = vadd.f32 %v1879_v6, %v2487_v50 }
 0x151   : > { %v1004_v13 = vmax.f32 %v1002_v1, %v1003_v7  ;;  %v1130_v14 = vmax.f32 %v1128_v2, %v1129_v8  ;;  %v996_v15 = vrot.slane %v995_v9, 4  ;;  %v1122_v16 = vrot.slane %v1121_v10, 4 }
 0x152   : > { %v1844_v19 = vpop.f32.mrf.mxu0  ;;  %v1880_v20 = vpop.f32.mrf.mxu1  ;;  %v935_v25 = vadd.f32 %v2487_v50, %v688_v11  ;;  %v971_v26 = vadd.f32 %v2487_v50, %v832_v12 }
 0x153   : > { %v1005_v21 = vrot.slane %v1004_v13, 2  ;;  %v1131_v22 = vrot.slane %v1130_v14, 2  ;;  %v997_v23 = vmax.f32 %v995_v9, %v996_v15  ;;  %v1123_v24 = vmax.f32 %v1121_v10, %v1122_v16 }
 0x154   : > { %v938_v27 = vadd.f32 %v1844_v19, %v2489_v51  ;;  %v974_v28 = vadd.f32 %v1880_v20, %v2489_v51  ;;  %v691_v29 = vpop.f32.mrf.mxu0  ;;  %v835_v30 = vpop.f32.mrf.mxu1 }
 0x155   : > { %v1006_v31 = vmax.f32 %v1004_v13, %v1005_v21  ;;  %v1132_v32 = vmax.f32 %v1130_v14, %v1131_v22  ;;  %v998_v33 = vrot.slane %v997_v23, 2  ;;  %v1124_v34 = vrot.slane %v1123_v24, 2 }
 0x156   : > { %v1016_v35 = vmax.f32 %v937_v17, %v938_v27  ;;  %v1142_v36 = vmax.f32 %v973_v18, %v974_v28  ;;  %v936_v37 = vadd.f32 %v2489_v51, %v691_v29  ;;  %v972_v38 = vadd.f32 %v2489_v51, %v835_v30  ;;  %v2507_v39 = vpop.f32.mrf.mxu0  ;;  %v2509_v40 = vpop.f32.mrf.mxu1 }
 0x157   : > { %v1007_v41 = vrot.slane %v1006_v31, 1  ;;  %v1133_v42 = vrot.slane %v1132_v32, 1  ;;  %v999_v43 = vmax.f32 %v997_v23, %v998_v33  ;;  %v1125_v44 = vmax.f32 %v1123_v24, %v1124_v34 }
 0x158   : > { %v1017_v46 = vrot.slane %v1016_v35, 4  ;;  %v1143_v47 = vrot.slane %v1142_v36, 4  ;;  %v1009_v48 = vmax.f32 %v935_v25, %v936_v37  ;;  %v1135_v49 = vmax.f32 %v971_v26, %v972_v38  ;;  %v2516_v52 = vpop.f32.mrf.mxu0  ;;  %v848_v53 = vpop.f32.mrf.mxu1 }
 0x159   : > { %v1008_v54 = vmax.f32 %v1006_v31, %v1007_v41  ;;  %v1134_v55 = vmax.f32 %v1132_v32, %v1133_v42  ;;  %v1000_v56 = vrot.slane %v999_v43, 1  ;;  %v1126_v57 = vrot.slane %v1125_v44, 1 }
 0x15a   : > { %v1018_v58 = vmax.f32 %v1016_v35, %v1017_v46  ;;  %v1144_v59 = vmax.f32 %v1142_v36, %v1143_v47  ;;  %v1010_v60 = vrot.slane %v1009_v48, 4  ;;  %v1136_v61 = vrot.slane %v1135_v49, 4  ;;  %v1848_v62 = vpop.f32.mrf.mxu0  ;;  %v1884_v63 = vpop.f32.mrf.mxu1 }
 0x15b   : > { %v1227_v0 = vadd.f32 %v2514_v45, %v1008_v54  ;;  %v1245_v1 = vadd.f32 %v2514_v45, %v1134_v55  ;;  %v1001_v2 = vmax.f32 %v999_v43, %v1000_v56  ;;  %v1127_v3 = vmax.f32 %v1125_v44, %v1126_v57 }
 0x15c   : > { %v1019_v4 = vrot.slane %v1018_v58, 2  ;;  %v1145_v5 = vrot.slane %v1144_v59, 2  ;;  %v1011_v6 = vmax.f32 %v1009_v48, %v1010_v60  ;;  %v1137_v7 = vmax.f32 %v1135_v49, %v1136_v61  ;;  %v707_v8 = vpop.f32.mrf.mxu0  ;;  %v851_v9 = vpop.f32.mrf.mxu1 }
 0x15d   : > { %v1259_v10 = vmax.f32 %v1227_v0, 0.0  ;;  %v1277_v11 = vmax.f32 %v1245_v1, 0.0  ;;  %v1226_v12 = vadd.f32 %v2514_v45, %v1001_v2  ;;  %v1244_v13 = vadd.f32 %v2514_v45, %v1127_v3 }
 0x15e   : > { %v1020_v14 = vmax.f32 %v1018_v58, %v1019_v4  ;;  %v1146_v15 = vmax.f32 %v1144_v59, %v1145_v5  ;;  %v1012_v16 = vrot.slane %v1011_v6, 2  ;;  %v1138_v17 = vrot.slane %v1137_v7, 2  ;;  %v2522_v18 = vpop.f32.mrf.mxu0  ;;  %v2524_v19 = vpop.f32.mrf.mxu1 }
 0x15f   : > { %v1291_v20 = vpack.c.bf16 %v1259_v10, %v1259_v10  ;;  %v1258_v21 = vmax.f32 %v1226_v12, 0.0  ;;  %v1309_v28 = vpack.c.bf16 %v1277_v11, %v1277_v11  ;;  %v1276_v29 = vmax.f32 %v1244_v13, 0.0 }
 0x160   : > { %v1021_v22 = vrot.slane %v1020_v14, 1  ;;  %v1147_v23 = vrot.slane %v1146_v15, 1  ;;  %v1013_v24 = vmax.f32 %v1011_v6, %v1012_v16  ;;  %v1139_v25 = vmax.f32 %v1137_v7, %v1138_v17  ;;  %v2526_v26 = vpop.f32.mrf.mxu0  ;;  %v864_v30 = vpop.f32.mrf.mxu1 }
 0x161   : > { %v1378_v27 = vunpack.c.l.b16 %v1291_v20  ;;  %v1290_v36 = vpack.c.bf16 %v1258_v21, %v1258_v21  ;;  %v1396_v43 = vunpack.c.l.b16 %v1309_v28  ;;  %v977_v44 = vadd.f32 %v2509_v40, %v2487_v50 }
 0x162   : > { %v1022_v31 = vmax.f32 %v1020_v14, %v1021_v22  ;;  %v1148_v32 = vmax.f32 %v1146_v15, %v1147_v23  ;;  %v1014_v33 = vrot.slane %v1013_v24, 1  ;;  %v1140_v34 = vrot.slane %v1139_v25, 1  ;;  %v1852_v35 = vpop.f32.mrf.mxu0  ;;  %v1888_v46 = vpop.f32.mrf.mxu1 }
 0x163   : > { %v1409_v47 = vrot.slane %v1378_v27, 7  ;;  %v2534_v48 = vpack.c.bf16 %v1276_v29, %v1276_v29  ;;  %v941_v56 = vadd.f32 %v2507_v39, %v2487_v50  ;;  %v975_v57 = vadd.f32 %v2487_v50, %v848_v53 }
 0x164   : > { %v1229_v37 = vadd.f32 %v2514_v45, %v1022_v31  ;;  %v1247_v38 = vadd.f32 %v2514_v45, %v1148_v32  ;;  %v1015_v41 = vmax.f32 %v1013_v24, %v1014_v33  ;;  %v2530_v42 = vpop.f32.mrf.mxu0  ;;  %v1141_v54 = vmax.f32 %v1139_v25, %v1140_v34  ;;  %v867_v5 = vpop.f32.mrf.mxu1 }
 0x165   : > { %v942_v58 = vadd.f32 %v1848_v62, %v2489_v51  ;;  %v978_v59 = vadd.f32 %v1884_v63, %v2489_v51  ;;  %v1377_v60 = vunpack.c.l.b16 %v1290_v36  ;;  %v939_v0 = vadd.f32 %v2487_v50, %v2516_v52 }
 0x166   : > { %v1228_v49 = vadd.f32 %v2514_v45, %v1015_v41  ;;  %v2537_v55 = vpop.f32.mrf.mxu0  ;;  %v1261_v40 = vmax.f32 %v1229_v37, 0.0  ;;  %v1279_v61 = vmax.f32 %v1247_v38, 0.0  ;;  %v940_v4 = vadd.f32 %v2489_v51, %v707_v8  ;;  %v2567_v21 = vpop.f32.mrf.mxu1 }
 0x167   : > { %v1030_v2 = vmax.f32 %v941_v56, %v942_v58  ;;  %v1156_v3 = vmax.f32 %v977_v44, %v978_v59  ;;  %v976_v39 = vadd.f32 %v2489_v51, %v851_v9  ;;  %v2550_v53 = vrot.slane %v1396_v43, 5 }
 0x168   : > { %v2546_v1 = vpop.f32.mrf.mxu0  ;;  %v1260_v62 = vmax.f32 %v1228_v49, 0.0  ;;  %v2553_v63 = vadd.f32 %v2514_v45, %v1141_v54  ;;  %v1023_v52 = vmax.f32 %v939_v0, %v940_v4  ;;  %v2558_v12 = vsel %vm1410_vm0, %v1409_v47, %v1377_v60  ;;  %v2585_v44 = vpop.f32.mrf.mxu1 }
 0x169   : > { %v1031_v7 = vrot.slane %v1030_v2, 4  ;;  %v1157_v10 = vrot.slane %v1156_v3, 4  ;;  %v1149_v11 = vmax.f32 %v975_v57, %v976_v39  ;;  %v1395_v8 = vunpack.c.l.b16 %v2534_v48 }
 0x16a   : > { %v2555_v6 = vpop.f32.mrf.mxu0  ;;  %v2561_v13 = vpack.c.bf16 %v1261_v40, %v1261_v40  ;;  %v2563_v9 = vpack.c.bf16 %v1279_v61, %v1279_v61  ;;  %v1024_v17 = vrot.slane %v1023_v52, 4  ;;  %v2569_v22 = vpack.c.bf16 %v1260_v62, %v1260_v62  ;;  %v1892_v4 = vpop.f32.mrf.mxu1 }
 0x16b   : > { %v1032_v15 = vmax.f32 %v1030_v2, %v1031_v7  ;;  %v1158_v16 = vmax.f32 %v1156_v3, %v1157_v10  ;;  %v1150_v20 = vrot.slane %v1149_v11, 4  ;;  %v1278_v23 = vmax.f32 %v2553_v63, 0.0 }
 0x16c   : > { %v2565_v14 = vpop.f32.mrf.mxu0  ;;  %v945_v24 = vadd.f32 %v2522_v18, %v2487_v50  ;;  %v981_v25 = vadd.f32 %v2524_v19, %v2487_v50  ;;  %v1025_v31 = vmax.f32 %v1023_v52, %v1024_v17  ;;  %v943_v33 = vadd.f32 %v2487_v50, %v2526_v26 }
 0x16d   : > { %v1033_v28 = vrot.slane %v1032_v15, 2  ;;  %v1159_v29 = vrot.slane %v1158_v16, 2  ;;  %v1151_v32 = vmax.f32 %v1149_v11, %v1150_v20  ;;  %v979_v34 = vadd.f32 %v2487_v50, %v864_v30 }
 0x16e   : > { %v2576_v27 = vpop.f32.mrf.mxu0  ;;  %v946_v36 = vadd.f32 %v1852_v35, %v2489_v51  ;;  %v982_v37 = vadd.f32 %v1888_v46, %v2489_v51  ;;  %v1026_v19 = vrot.slane %v1025_v31, 2  ;;  %v944_v54 = vadd.f32 %v2489_v51, %v2530_v42 }
 0x16f   : > { %v1034_v18 = vmax.f32 %v1032_v15, %v1033_v28  ;;  %v1160_v41 = vmax.f32 %v1158_v16, %v1159_v29  ;;  %v1152_v43 = vrot.slane %v1151_v32, 2  ;;  %v980_v26 = vadd.f32 %v2489_v51, %v867_v5 }
 0x170   : > { %v2583_v38 = vpop.f32.mrf.mxu0  ;;  %v1044_v47 = vmax.f32 %v945_v24, %v946_v36  ;;  %v1170_v49 = vmax.f32 %v981_v25, %v982_v37  ;;  %v1027_v46 = vmax.f32 %v1025_v31, %v1026_v19  ;;  %v1037_v60 = vmax.f32 %v943_v33, %v944_v54  ;;  %v883_v31 = vpop.f32.mrf.mxu1 }
 0x171   : > { %v1035_v35 = vrot.slane %v1034_v18, 1  ;;  %v1161_v56 = vrot.slane %v1160_v41, 1  ;;  %v1153_v57 = vmax.f32 %v1151_v32, %v1152_v43  ;;  %v1163_v40 = vmax.f32 %v979_v34, %v980_v26 }
 0x172   : > { %v2590_v30 = vpop.f32.mrf.mxu0  ;;  %v1045_v58 = vrot.slane %v1044_v47, 4  ;;  %v1171_v59 = vrot.slane %v1170_v49, 4  ;;  %v1028_v2 = vrot.slane %v1027_v46, 1  ;;  %v1038_v42 = vrot.slane %v1037_v60, 4 }
 0x173   : > { %v1036_v61 = vmax.f32 %v1034_v18, %v1035_v35  ;;  %v1162_v0 = vmax.f32 %v1160_v41, %v1161_v56  ;;  %v1154_v3 = vrot.slane %v1153_v57, 1  ;;  %v1164_v63 = vrot.slane %v1163_v40, 4 }
 0x174   : > { %v1046_v39 = vmax.f32 %v1044_v47, %v1045_v58  ;;  %v1172_v62 = vmax.f32 %v1170_v49, %v1171_v59  ;;  %v2592_v5 = vpop.f32.mrf.mxu0  ;;  %v1029_v52 = vmax.f32 %v1027_v46, %v1028_v2  ;;  %v1039_v17 = vmax.f32 %v1037_v60, %v1038_v42 }
 0x175   : > { %v1231_v7 = vadd.f32 %v2514_v45, %v1036_v61  ;;  %v1249_v10 = vadd.f32 %v2514_v45, %v1162_v0  ;;  %v1155_v11 = vmax.f32 %v1153_v57, %v1154_v3  ;;  %v1165_v20 = vmax.f32 %v1163_v40, %v1164_v63  ;;  %v1895_v57 = vpop.f32.mrf.mxu1 }
 0x176   : > { %v1047_v15 = vrot.slane %v1046_v39, 2  ;;  %v1173_v16 = vrot.slane %v1172_v62, 2  ;;  %v1380_v24 = vunpack.c.l.b16 %v2561_v13  ;;  %v1230_v28 = vadd.f32 %v2514_v45, %v1029_v52  ;;  %v2599_v37 = vpop.f32.mrf.mxu0 }
 0x177   : > { %v1263_v25 = vmax.f32 %v1231_v7, 0.0  ;;  %v1248_v29 = vadd.f32 %v2514_v45, %v1155_v11  ;;  %v1040_v34 = vrot.slane %v1039_v17, 2  ;;  %v1166_v36 = vrot.slane %v1165_v20, 2 }
 0x178   : > { %v1048_v32 = vmax.f32 %v1046_v39, %v1047_v15  ;;  %v1174_v33 = vmax.f32 %v1172_v62, %v1173_v16  ;;  %v1379_v18 = vunpack.c.l.b16 %v2569_v22  ;;  %v2602_v41 = vpack.c.bf16 %v1278_v23, %v1278_v23  ;;  %v2611_v60 = vpop.f32.mrf.mxu0 }
 0x179   : > { %v1295_v19 = vpack.c.bf16 %v1263_v25, %v1263_v25  ;;  %v1281_v43 = vmax.f32 %v1249_v10, 0.0  ;;  %v1262_v47 = vmax.f32 %v1230_v28, 0.0  ;;  %v1041_v49 = vmax.f32 %v1039_v17, %v1040_v34  ;;  %v896_v10 = vpop.f32.mrf.mxu1 }
 0x17a   : > { %v1175_v13 = vrot.slane %v1174_v33, 1  ;;  %v1167_v54 = vmax.f32 %v1165_v20, %v1166_v36  ;;  %v2606_v26 = vrot.slane %v1395_v8, 6  ;;  %v1398_v35 = vunpack.c.l.b16 %v2563_v9  ;;  %v2633_v17 = vpop.f32.mrf.mxu0 }
 0x17b   : > { %v1280_v56 = vmax.f32 %v1248_v29, 0.0  ;;  %v1049_v46 = vrot.slane %v1048_v32, 1  ;;  %v2609_v58 = vrot.slane %v1380_v24, 5  ;;  %v1042_v23 = vrot.slane %v1041_v49, 1 }
 0x17c   : > { %v1176_v22 = vmax.f32 %v1174_v33, %v1175_v13  ;;  %v1168_v59 = vrot.slane %v1167_v54, 1  ;;  %v2613_v40 = vrot.slane %v1379_v18, 6  ;;  %v1397_v61 = vunpack.c.l.b16 %v2602_v41  ;;  %v1896_v18 = vpop.f32.mrf.mxu1 }
 0x17d   : > { %v1382_v0 = vunpack.c.l.b16 %v1295_v19  ;;  %v2616_v48 = vpack.c.bf16 %v1281_v43, %v1281_v43  ;;  %v2618_v8 = vpack.c.bf16 %v1262_v47, %v1262_v47  ;;  %v1043_v3 = vmax.f32 %v1041_v49, %v1042_v23  ;;  %v2648_v43 = vpop.f32.mrf.mxu0 }
 0x17e   : > { %v1251_v2 = vadd.f32 %v2514_v45, %v1176_v22  ;;  %v1169_v39 = vmax.f32 %v1167_v54, %v1168_v59  ;;  %v2621_v62 = vpack.c.bf16 %v1280_v56, %v1280_v56  ;;  %v2623_v42 = vmax.f32 %v1048_v32, %v1049_v46 }
 0x17f   : > { %v949_v63 = vadd.f32 %v2537_v55, %v2487_v50  ;;  %v985_v7 = vadd.f32 %v2567_v21, %v2487_v50  ;;  %v1232_v11 = vadd.f32 %v2514_v45, %v1043_v3  ;;  %v947_v16 = vadd.f32 %v2487_v50, %v2546_v1 }
 0x180   : > { %v1283_v52 = vmax.f32 %v1251_v2, 0.0  ;;  %v1250_v15 = vadd.f32 %v2514_v45, %v1169_v39  ;;  %v983_v20 = vadd.f32 %v2487_v50, %v2585_v44  ;;  %v950_v55 = vadd.f32 %v2555_v6, %v2489_v51  ;;  %v899_v2 = vpop.f32.mrf.mxu1 }
 0x181   : > { %v986_v24 = vadd.f32 %v1892_v4, %v2489_v51  ;;  %v948_v21 = vadd.f32 %v2489_v51, %v2565_v14  ;;  %v1264_v28 = vmax.f32 %v1232_v11, 0.0  ;;  %v984_v32 = vadd.f32 %v2489_v51, %v883_v31 }
 0x182   : > { %v1315_v25 = vpack.c.bf16 %v1283_v52, %v1283_v52  ;;  %v1282_v29 = vmax.f32 %v1250_v15, 0.0  ;;  %v2643_v33 = vrot.slane %v1382_v0, 3  ;;  %v1058_v1 = vmax.f32 %v949_v63, %v950_v55 }
 0x183   : > { %v1184_v34 = vmax.f32 %v985_v7, %v986_v24  ;;  %v1051_v36 = vmax.f32 %v947_v16, %v948_v21  ;;  %v1381_v44 = vunpack.c.l.b16 %v2618_v8  ;;  %v1177_v4 = vmax.f32 %v983_v20, %v984_v32  ;;  %v2663_v7 = vpop.f32.mrf.mxu0 }
 0x184   : > { %v1402_v19 = vunpack.c.l.b16 %v1315_v25  ;;  %v2646_v6 = vpack.c.bf16 %v1282_v29, %v1282_v29  ;;  %v1059_v14 = vrot.slane %v1058_v1, 4  ;;  %v953_v31 = vadd.f32 %v2576_v27, %v2487_v50 }
 0x185   : > { %v1185_v47 = vrot.slane %v1184_v34, 4  ;;  %v1052_v13 = vrot.slane %v1051_v36, 4  ;;  %v2654_v54 = vpack.c.bf16 %v1264_v28, %v1264_v28  ;;  %v1178_v56 = vrot.slane %v1177_v4, 4 }
 0x186   : > { %v2652_v49 = vrot.slane %v1402_v19, 7  ;;  %v989_v46 = vadd.f32 %v1895_v57, %v2487_v50  ;;  %v1401_v22 = vunpack.c.l.b16 %v2646_v6  ;;  %v1060_v23 = vmax.f32 %v1058_v1, %v1059_v14  ;;  %v2669_v1 = vpop.f32.mrf.mxu0 }
 0x187   : > { %v1186_v59 = vmax.f32 %v1184_v34, %v1185_v47  ;;  %v1053_v0 = vmax.f32 %v1051_v36, %v1052_v13  ;;  %v1179_v3 = vmax.f32 %v1177_v4, %v1178_v56  ;;  %v951_v39 = vadd.f32 %v2487_v50, %v2583_v38 }
 0x188   : > { %v987_v63 = vadd.f32 %v2487_v50, %v896_v10  ;;  %v954_v27 = vadd.f32 %v2590_v30, %v2489_v51  ;;  %v1061_v52 = vrot.slane %v1060_v23, 2  ;;  %v990_v15 = vadd.f32 %v1896_v18, %v2489_v51 }
 0x189   : > { %v1187_v11 = vrot.slane %v1186_v59, 2  ;;  %v1054_v57 = vrot.slane %v1053_v0, 2  ;;  %v1180_v16 = vrot.slane %v1179_v3, 2  ;;  %v952_v55 = vadd.f32 %v2489_v51, %v2592_v5 }
 0x18a   : > { %v1072_v20 = vmax.f32 %v953_v31, %v954_v27  ;;  %v988_v24 = vadd.f32 %v2489_v51, %v899_v2  ;;  %v1062_v38 = vmax.f32 %v1060_v23, %v1061_v52  ;;  %v1198_v25 = vmax.f32 %v989_v46, %v990_v15 }
 0x18b   : > { %v1188_v21 = vmax.f32 %v1186_v59, %v1187_v11  ;;  %v1055_v10 = vmax.f32 %v1053_v0, %v1054_v57  ;;  %v1181_v28 = vmax.f32 %v1179_v3, %v1180_v16  ;;  %v1065_v29 = vmax.f32 %v951_v39, %v952_v55  ;;  %v1899_v3 = vpop.f32.mrf.mxu1  ;;  %v2671_v39 = vpop.f32.mrf.mxu0 }
 0x18c   : > { %v1073_v30 = vrot.slane %v1072_v20, 4  ;;  %v1191_v32 = vmax.f32 %v987_v63, %v988_v24  ;;  %v1063_v34 = vrot.slane %v1062_v38, 1  ;;  %v1199_v19 = vrot.slane %v1198_v25, 4 }
 0x18d   : > { %v1189_v36 = vrot.slane %v1188_v21, 1  ;;  %v1056_v18 = vrot.slane %v1055_v10, 1  ;;  %v1182_v4 = vrot.slane %v1181_v28, 1  ;;  %v1066_v47 = vrot.slane %v1065_v29, 4 }
 0x18e   : > { %v1074_v14 = vmax.f32 %v1072_v20, %v1073_v30  ;;  %v1192_v5 = vrot.slane %v1191_v32, 4  ;;  %v1064_v13 = vmax.f32 %v1062_v38, %v1063_v34  ;;  %v1200_v23 = vmax.f32 %v1198_v25, %v1199_v19 }
 0x18f   : > { %v1190_v31 = vmax.f32 %v1188_v21, %v1189_v36  ;;  %v1057_v56 = vmax.f32 %v1055_v10, %v1056_v18  ;;  %v1183_v59 = vmax.f32 %v1181_v28, %v1182_v4  ;;  %v1067_v0 = vmax.f32 %v1065_v29, %v1066_v47  ;;  %v912_v29 = vpop.f32.mrf.mxu1 }
 0x190   : > { %v1075_v46 = vrot.slane %v1074_v14, 2  ;;  %v1193_v2 = vmax.f32 %v1191_v32, %v1192_v5  ;;  %v1235_v63 = vadd.f32 %v2514_v45, %v1064_v13  ;;  %v1201_v11 = vrot.slane %v1200_v23, 2  ;;  %v2677_v32 = vpop.f32.mrf.mxu0 }
 0x191   : > { %v1253_v27 = vadd.f32 %v2514_v45, %v1190_v31  ;;  %v1234_v52 = vadd.f32 %v2514_v45, %v1057_v56  ;;  %v1252_v57 = vadd.f32 %v2514_v45, %v1183_v59  ;;  %v1068_v16 = vrot.slane %v1067_v0, 2 }
 0x192   : > { %v1076_v15 = vmax.f32 %v1074_v14, %v1075_v46  ;;  %v1194_v20 = vrot.slane %v1193_v2, 2  ;;  %v1267_v55 = vmax.f32 %v1235_v63, 0.0  ;;  %v1202_v21 = vmax.f32 %v1200_v23, %v1201_v11  ;;  %v1900_v63 = vpop.f32.mrf.mxu1 }
 0x193   : > { %v1285_v24 = vmax.f32 %v1253_v27, 0.0  ;;  %v1266_v38 = vmax.f32 %v1234_v52, 0.0  ;;  %v1284_v10 = vmax.f32 %v1252_v57, 0.0  ;;  %v1069_v28 = vmax.f32 %v1067_v0, %v1068_v16  ;;  %v1871_v27 = vpop.f32.mrf.mxu0 }
 0x194   : > { %v1077_v25 = vrot.slane %v1076_v15, 1  ;;  %v1195_v30 = vmax.f32 %v1193_v2, %v1194_v20  ;;  %v1299_v34 = vpack.c.bf16 %v1267_v55, %v1267_v55  ;;  %v1203_v19 = vrot.slane %v1202_v21, 1 }
 0x195   : > { %v1317_v36 = vpack.c.bf16 %v1285_v24, %v1285_v24  ;;  %v1298_v18 = vpack.c.bf16 %v1266_v38, %v1266_v38  ;;  %v1316_v4 = vpack.c.bf16 %v1284_v10, %v1284_v10  ;;  %v1070_v14 = vrot.slane %v1069_v28, 1  ;;  %v915_v10 = vpop.f32.mrf.mxu1 }
 0x196   : > { %v1078_v47 = vmax.f32 %v1076_v15, %v1077_v25  ;;  %v1196_v5 = vrot.slane %v1195_v30, 1  ;;  %v2681_v13 = vrot.slane %v1381_v44, 4  ;;  %v2685_v31 = vadd.f32 %v2514_v45, %v2623_v42  ;;  %v800_v25 = vpop.f32.mrf.mxu0 }
 0x197   : > { %v1386_v56 = vunpack.c.l.b16 %v1299_v34  ;;  %v1204_v23 = vmax.f32 %v1202_v21, %v1203_v19  ;;  %v1403_v59 = vunpack.c.l.b16 %v1316_v4  ;;  %v1071_v0 = vmax.f32 %v1069_v28, %v1070_v14 }
 0x198   : > { %v1237_v46 = vadd.f32 %v2514_v45, %v1078_v47  ;;  %v1197_v2 = vmax.f32 %v1195_v30, %v1196_v5  ;;  %v1383_v52 = vunpack.c.l.b16 %v2654_v54  ;;  %v1459_v8 = vsel %vm1410_vm0, %v2652_v49, %v1401_v22 }
 0x199   : > { %v1404_v44 = vunpack.c.l.b16 %v1317_v36  ;;  %v1255_v42 = vadd.f32 %v2514_v45, %v1204_v23  ;;  %v1385_v11 = vunpack.c.l.b16 %v1298_v18  ;;  %v1236_v15 = vadd.f32 %v2514_v45, %v1071_v0 }
 0x19a   : > { %v1269_v57 = vmax.f32 %v1237_v46, 0.0  ;;  %v1254_v16 = vadd.f32 %v2514_v45, %v1197_v2  ;;  %v1430_v20 = vrot.slane %v1386_v56, 7  ;;  %v957_v24 = vadd.f32 %v2599_v37, %v2487_v50 }
 0x19b   : > { %v1287_v55 = vmax.f32 %v1255_v42, 0.0  ;;  %v993_v38 = vadd.f32 %v1899_v3, %v2487_v50  ;;  %v1460_v6 = vrot.slane %v1403_v59, 6  ;;  %v1268_v49 = vmax.f32 %v1236_v15, 0.0  ;;  %v1872_v59 = vpop.f32.mrf.mxu0 }
 0x19c   : > { %v2699_v21 = vpack.c.bf16 %v1269_v57, %v1269_v57  ;;  %v1286_v22 = vmax.f32 %v1254_v16, 0.0  ;;  %v991_v30 = vadd.f32 %v2487_v50, %v912_v29  ;;  %v958_v34 = vadd.f32 %v2633_v17, %v2489_v51 }
 0x19d   : > { %v2701_v28 = vpack.c.bf16 %v1287_v55, %v1287_v55  ;;  %v994_v36 = vadd.f32 %v1900_v63, %v2489_v51  ;;  %v2707_v18 = vpack.c.bf16 %v1268_v49, %v1268_v49  ;;  %v955_v3 = vadd.f32 %v2487_v50, %v2611_v60 }
 0x19e   : > { %v2709_v37 = vpack.c.bf16 %v1286_v22, %v1286_v22  ;;  %v956_v19 = vadd.f32 %v2489_v51, %v2648_v43  ;;  %v2715_v4 = vrot.slane %v1404_v44, 5  ;;  %v1086_v47 = vmax.f32 %v957_v24, %v958_v34 }
 0x19f   : > { %v1212_v14 = vmax.f32 %v993_v38, %v994_v36  ;;  %v992_v29 = vadd.f32 %v2489_v51, %v915_v10  ;;  %v2719_v17 = vsel %vm1410_vm0, %v1430_v20, %v1385_v11  ;;  %v2722_v5 = vsel %vm1413_vm1, %v1460_v6, %v1459_v8  ;;  %v803_v38 = vpop.f32.mrf.mxu0 }
 0x1a0   : > { %v1388_v56 = vunpack.c.l.b16 %v2699_v21  ;;  %v1079_v23 = vmax.f32 %v955_v3, %v956_v19  ;;  %v1406_v60 = vunpack.c.l.b16 %v2701_v28  ;;  %v1087_v46 = vrot.slane %v1086_v47, 4 }
 0x1a1   : > { %v1213_v43 = vrot.slane %v1212_v14, 4  ;;  %v1205_v0 = vmax.f32 %v991_v30, %v992_v29  ;;  %v1387_v2 = vunpack.c.l.b16 %v2707_v18  ;;  %v1405_v63 = vunpack.c.l.b16 %v2709_v37 }
 0x1a2   : > { %v1080_v44 = vrot.slane %v1079_v23, 4  ;;  %v961_v42 = vadd.f32 %v2663_v7, %v2487_v50  ;;  %v1088_v11 = vmax.f32 %v1086_v47, %v1087_v46  ;;  %v959_v15 = vadd.f32 %v2487_v50, %v2669_v1 }
 0x1a3   : > { %v1214_v8 = vmax.f32 %v1212_v14, %v1213_v43  ;;  %v1206_v57 = vrot.slane %v1205_v0, 4  ;;  %v962_v20 = vadd.f32 %v2671_v39, %v2489_v51  ;;  %v960_v55 = vadd.f32 %v2489_v51, %v2677_v32 }
 0x1a4   : > { %v1081_v16 = vmax.f32 %v1079_v23, %v1080_v44  ;;  %v965_v24 = vadd.f32 %v1871_v27, %v2487_v50  ;;  %v1089_v6 = vrot.slane %v1088_v11, 2  ;;  %v963_v7 = vadd.f32 %v2487_v50, %v800_v25 }
 0x1a5   : > { %v1215_v49 = vrot.slane %v1214_v8, 2  ;;  %v1207_v22 = vmax.f32 %v1205_v0, %v1206_v57  ;;  %v1100_v30 = vmax.f32 %v961_v42, %v962_v20  ;;  %v1093_v34 = vmax.f32 %v959_v15, %v960_v55 }
 0x1a6   : > { %v1082_v10 = vrot.slane %v1081_v16, 2  ;;  %v966_v1 = vadd.f32 %v1872_v59, %v2489_v51  ;;  %v1090_v36 = vmax.f32 %v1088_v11, %v1089_v6  ;;  %v964_v39 = vadd.f32 %v2489_v51, %v803_v38 }
 0x1a7   : > { %v1216_v3 = vmax.f32 %v1214_v8, %v1215_v49  ;;  %v1208_v19 = vrot.slane %v1207_v22, 2  ;;  %v1101_v32 = vrot.slane %v1100_v30, 4  ;;  %v1094_v14 = vrot.slane %v1093_v34, 4 }
 0x1a8   : > { %v1083_v47 = vmax.f32 %v1081_v16, %v1082_v10  ;;  %v1114_v27 = vmax.f32 %v965_v24, %v966_v1  ;;  %v1091_v29 = vrot.slane %v1090_v36, 1  ;;  %v1107_v43 = vmax.f32 %v963_v7, %v964_v39 }
 0x1a9   : > { %v1217_v23 = vrot.slane %v1216_v3, 1  ;;  %v1209_v46 = vmax.f32 %v1207_v22, %v1208_v19  ;;  %v1102_v50 = vmax.f32 %v1100_v30, %v1101_v32  ;;  %v1095_v25 = vmax.f32 %v1093_v34, %v1094_v14 }
 0x1aa   : > { %v1084_v0 = vrot.slane %v1083_v47, 1  ;;  %v1115_v44 = vrot.slane %v1114_v27, 4  ;;  %v1092_v42 = vmax.f32 %v1090_v36, %v1091_v29  ;;  %v1108_v11 = vrot.slane %v1107_v43, 4 }
 0x1ab   : > { %v1218_v57 = vmax.f32 %v1216_v3, %v1217_v23  ;;  %v1210_v59 = vrot.slane %v1209_v46, 1  ;;  %v1103_v15 = vrot.slane %v1102_v50, 2  ;;  %v1096_v20 = vrot.slane %v1095_v25, 2 }
 0x1ac   : > { %v1085_v8 = vmax.f32 %v1083_v47, %v1084_v0  ;;  %v1116_v51 = vmax.f32 %v1114_v27, %v1115_v44  ;;  %v1239_v16 = vadd.f32 %v2514_v45, %v1092_v42  ;;  %v1109_v38 = vmax.f32 %v1107_v43, %v1108_v11 }
 0x1ad   : > { %v1257_v55 = vadd.f32 %v2514_v45, %v1218_v57  ;;  %v1211_v24 = vmax.f32 %v1209_v46, %v1210_v59  ;;  %v1104_v49 = vmax.f32 %v1102_v50, %v1103_v15  ;;  %v1097_v22 = vmax.f32 %v1095_v25, %v1096_v20 }
 0x1ae   : > { %v1238_v6 = vadd.f32 %v2514_v45, %v1085_v8  ;;  %v1117_v7 = vrot.slane %v1116_v51, 2  ;;  %v1271_v10 = vmax.f32 %v1239_v16, 0.0  ;;  %v1110_v1 = vrot.slane %v1109_v38, 2 }
 0x1af   : > { %v1289_v30 = vmax.f32 %v1257_v55, 0.0  ;;  %v1256_v34 = vadd.f32 %v2514_v45, %v1211_v24  ;;  %v1105_v3 = vrot.slane %v1104_v49, 1  ;;  %v1098_v19 = vrot.slane %v1097_v22, 1 }
 0x1b0   : > { %v1270_v36 = vmax.f32 %v1238_v6, 0.0  ;;  %v1118_v39 = vmax.f32 %v1116_v51, %v1117_v7  ;;  %v1303_v47 = vpack.c.bf16 %v1271_v10, %v1271_v10  ;;  %v1111_v27 = vmax.f32 %v1109_v38, %v1110_v1 }
 0x1b1   : > { %v2744_v32 = vpack.c.bf16 %v1289_v30, %v1289_v30  ;;  %v1288_v14 = vmax.f32 %v1256_v34, 0.0  ;;  %v1106_v23 = vmax.f32 %v1104_v49, %v1105_v3  ;;  %v1099_v46 = vmax.f32 %v1097_v22, %v1098_v19 }
 0x1b2   : > { %v1302_v29 = vpack.c.bf16 %v1270_v36, %v1270_v36  ;;  %v1119_v43 = vrot.slane %v1118_v39, 1  ;;  %v1434_v0 = vrot.slane %v1388_v56, 5  ;;  %v2750_v50 = vrot.slane %v1406_v60, 3 }
 0x1b3   : > { %v1432_v25 = vrot.slane %v1387_v2, 6  ;;  %v1112_v44 = vrot.slane %v1111_v27, 1  ;;  %v1241_v57 = vadd.f32 %v2514_v45, %v1106_v23  ;;  %v1240_v59 = vadd.f32 %v2514_v45, %v1099_v46 }
 0x1b4   : > { %v1389_v42 = vunpack.c.l.b16 %v1302_v29  ;;  %v1120_v11 = vmax.f32 %v1118_v39, %v1119_v43  ;;  %v1464_v8 = vrot.slane %v1405_v63, 4  ;;  %v1390_v15 = vunpack.c.l.b16 %v1303_v47 }
 0x1b5   : > { %v1408_v21 = vunpack.c.l.b16 %v2744_v32  ;;  %v1113_v56 = vmax.f32 %v1111_v27, %v1112_v44  ;;  %v1320_v28 = vpack.c.bf16 %v1288_v14, %v1288_v14  ;;  %v1272_v60 = vmax.f32 %v1240_v59, 0.0 }
 0x1b6   : > { %v1243_v18 = vadd.f32 %v2514_v45, %v1120_v11  ;;  %v1265_v2 = vmax.f32 %v2685_v31, 0.0  ;;  %v1436_v20 = vrot.slane %v1389_v42, 4  ;;  %v1273_v16 = vmax.f32 %v1241_v57, 0.0 }
 0x1b7   : > { %v1242_v51 = vadd.f32 %v2514_v45, %v1113_v56  ;;  %v1414_v37 = vsel %vm1413_vm1, %v2613_v40, %v2558_v12  ;;  %v1304_v63 = vpack.c.bf16 %v1272_v60, %v1272_v60  ;;  %v1424_v31 = vrot.slane %v1383_v52, 2 }
 0x1b8   : > { %v1275_v55 = vmax.f32 %v1243_v18, 0.0  ;;  %v1297_v24 = vpack.c.bf16 %v1265_v2, %v1265_v2  ;;  %v1417_v38 = vsel %vm1416_vm2, %v2609_v58, %v1414_v37  ;;  %v1305_v49 = vpack.c.bf16 %v1273_v16, %v1273_v16 }
 0x1b9   : > { %v1274_v6 = vmax.f32 %v1242_v51, 0.0  ;;  %v1420_v22 = vsel %vm1419_vm3, %v2681_v13, %v1417_v38  ;;  %v1438_v45 = vrot.slane %v1390_v15, 3  ;;  %v1391_v7 = vunpack.c.l.b16 %v1304_v63 }
 0x1ba   : > { %v1307_v10 = vpack.c.bf16 %v1275_v55, %v1275_v55  ;;  %v1384_v30 = vunpack.c.l.b16 %v1297_v24  ;;  %v1407_v34 = vunpack.c.l.b16 %v1320_v28  ;;  %v1392_v40 = vunpack.c.l.b16 %v1305_v49 }
 0x1bb   : > { %v1306_v12 = vpack.c.bf16 %v1274_v6, %v1274_v6  ;;  %v1433_v1 = vsel %vm1413_vm1, %v1432_v25, %v2719_v17  ;;  %v1423_v58 = vsel %vm1422_vm4, %v2643_v33, %v1420_v22  ;;  %v1440_v13 = vrot.slane %v1391_v7, 2 }
 0x1bc   : > { %v1394_v36 = vunpack.c.l.b16 %v1307_v10  ;;  %v1435_v3 = vsel %vm1416_vm2, %v1434_v0, %v1433_v1  ;;  %v1426_v54 = vsel %vm1425_vm5, %v1424_v31, %v1423_v58  ;;  %v1427_v52 = vrot.slane %v1384_v30, 1 }
 0x1bd   : > { %v1393_v19 = vunpack.c.l.b16 %v1306_v12  ;;  %v1437_v39 = vsel %vm1419_vm3, %v1436_v20, %v1435_v3  ;;  %v1442_v14 = vrot.slane %v1392_v40, 1  ;;  %v1463_v17 = vsel %vm1416_vm2, %v2715_v4, %v2722_v5 }
 0x1be   : > { %v1444_v47 = vrot.slane %v1394_v36, 7  ;;  %v1439_v32 = vsel %vm1422_vm4, %v1438_v45, %v1437_v39  ;;  %v1399_v27 = vunpack.c.l.b16 %v2621_v62  ;;  %v1468_v33 = vrot.slane %v1407_v34, 2 }
 0x1bf   : > { %v1441_v29 = vsel %vm1425_vm5, %v1440_v13, %v1439_v32  ;;  %v1465_v23 = vsel %vm1419_vm3, %v1464_v8, %v1463_v17  ;;  %v1400_v46 = vunpack.c.l.b16 %v2616_v48  ;;  %v1429_v0 = vsel %vm1428_vm6, %v1427_v52, %v1426_v54 }
 0x1c0   : > { %v1445_v43 = vsel %vm1410_vm0, %v1444_v47, %v1393_v19  ;;  %v1443_v25 = vsel %vm1428_vm6, %v1442_v14, %v1441_v29  ;;  %v1450_v44 = vrot.slane %v1397_v61, 4  ;;  %v1452_v5 = vrot.slane %v1398_v35, 3 }
 0x1c1   : > { %v1447_v4 = vsel %vm1413_vm1, %v2606_v26, %v1445_v43  ;;  %v1472_v62 = vpack.c.b16 %v1443_v25, %v1429_v0  ;;  %v1470_v42 = vrot.slane %v1408_v21, 1  ;;  %v1467_v57 = vsel %vm1422_vm4, %v2750_v50, %v1465_v23  ;;  %v1750_v50 = vld [vmem:[%s2863_s5] ss:$0 sm:$0xff] }
 0x1c2   : > { %v1449_v48 = vsel %vm1416_vm2, %v2550_v53, %v1447_v4  ;;  %v1454_v59 = vrot.slane %v1399_v27, 2  ;;  %v1469_v61 = vsel %vm1425_vm5, %v1468_v33, %v1467_v57  ;;  %v1456_v11 = vrot.slane %v1400_v46, 1 }
 0x1c3   : > { %1917 = vmatprep.mubr.bf16.mxu1 %v1472_v62  ;;  %v1451_v41 = vsel %vm1419_vm3, %v1450_v44, %v1449_v48  ;;  %v1471_v8 = vsel %vm1428_vm6, %v1470_v42, %v1469_v61 }
 0x1c4   : > { %v1453_v26 = vsel %vm1422_vm4, %v1452_v5, %v1451_v41 }
 0x1c5   : > { %v1455_v9 = vsel %vm1425_vm5, %v1454_v59, %v1453_v26 }
 0x1c6   : > { %v1457_v35 = vsel %vm1428_vm6, %v1456_v11, %v1455_v9 }
 0x1c7   : > { %v1473_v53 = vpack.c.b16 %v1471_v8, %v1457_v35 }
 0x1c9   : > { %1918 = vmatmul.mubr.bf16.vlgmr.msra.gmra.mxu1 %v1473_v53 }
 0x289   : > { %v1919_v15 = vpop.f32.mrf.mxu1 }
 0x28a   : > { %v1567_v21 = vadd.f32 %v1919_v15, %v1750_v50 }
 0x28b   : > { %v1558_v56 = vpop.f32.mrf.mxu1 }
 0x28c   : > { %1575 = vst [vmem:[%s314_s8 + $0x10] sm:$0xff] %v1567_v21  ;;  %v1559_v28 = vadd.f32 %v1750_v50, %v1558_v56 }
 0x28d   : > { %v1920_v60 = vpop.f32.mrf.mxu1 }
 0x28e   : > { %1573 = vst [vmem:[%s314_s8] sm:$0xff] %v1559_v28  ;;  %v1570_v18 = vadd.f32 %v1920_v60, %v1750_v50 }
 0x28f   : > { %v1561_v2 = vpop.f32.mrf.mxu1 }
 0x290   : > { %1576 = vst [vmem:[%s314_s8 + $0x18] sm:$0xff] %v1570_v18  ;;  %v1562_v20 = vadd.f32 %v1750_v50, %v1561_v2 }
 0x292   : > { %1574 = vst [vmem:[%s314_s8 + $0x8] sm:$0xff] %v1562_v20 }
 0x293   : > { %2185 = shalt.err (!%p2182_p10)
}
 0x294   : > { %s2186_s29 = scalar_lea.hbm %s2815_s18, 512  ;;  %s2190_s7 = scalar_lea.hbm %s2864_s6, 1024 }
 0x295   : > { %p2187_p6 = scmp.ne.s32.totalorder %s2815_s18, %s2186_s29  ;;  %p2191_p3 = scmp.lt.s32.totalorder %s2815_s18, %s2864_s6 }
 0x296   : > { %p2192_p11 = scmp.lt.s32.totalorder %s2190_s7, %s2186_s29 }
 0x297   : > { %p2188_p4 = pnand %p2187_p6, %p2885_p1 }
 0x298   : > { %p2193_p5 = por %p2192_p11, %p2191_p3 }
 0x299   : > { %p2189_p8 = pneg %p2188_p4 }
 0x29b   : > { %p2194_p7 = pnand %p2193_p5, %p2189_p8 }
 0x29d   : > { %2197 = shalt.err (!%p2194_p7)
}
 0x29e   : > { %s2253_s17 = smov 128   ;;  %s2254_s10 = smov 8  }
 0x29f   : > { %1951 = dma.vmem_to_hbm [thread:$0]  (%p2885_p1), %s2810_s26, 512, %s2815_s18, %s1578_s15, %s2253_s17, %s2253_s17, %s2254_s10  }
 0x2a0 PF: > { %s1606_s12 = sand.u32 1, %s2232_s21   ;;  %p2886_p12 = scmp.ne.s32.totalorder %s2872_s28, 0 }
 0x2a1   : > { %p2887_p9 = scmp.ge.s32.totalorder %s2244_s24, 2  ;;  %s1607_s25 = scalar_lea.sflag [#allocation4], %s1606_s12 }
 0x2a3   : > { %p1968_p13 = pnand %p2887_p9, %p2886_p12 }
 0x2a5   : > { %p1969_p0 = pneg %p1968_p13 }
 0x2a7   : > { %2227 = dma.done.wait (%p1969_p0), %s1607_s25, 512  }
 0x2a8   : > { %2229 = vsyncadd (%p1969_p0), %s1607_s25, 4294966784  ;;  %p21_p2 = scmp.ge.s32.totalorder %s2379_s9, 4   ;;  %s2888_s21 = smov %s2236_s22 }
 0x2a9   : > { %s2889_s22 = smov %s2240_s23  ;;  %s2890_s23 = smov %s2389_s11 }
 0x2aa   : > { %s2891_s24 = smov %s2379_s9  ;;  %23 = sbr.rel (!%p21_p2) target bundleno = 7 (0x7), region = 101 }
 0x2af   :  { %1612 = vsyncpa [#allocation3], 1 }
 0x2b0   :  { %1614 = vsyncpa [#allocation3 + $0x1], 1 }
 0x2b1   :  { %1615 = vsyncpa [#allocation6], 1 }
 0x2b2   :  { %1616 = vsyncpa [#allocation9], 1 }
 0x2b3   :  { %1617 = vsyncpa [#allocation4], 1 }
 0x2b4   :  { %1619 = vsyncpa [#allocation4 + $0x1], 1 }

</bundles_post_ra>
